<compile_context>
chip_gen: v6e
topology: v6e:2x2x1
jax: 0.10.0
libtpu: 0.0.40
codegen_flags: <defaults>
</compile_context>

<pallas_src>
import functools

import jax
import jax.numpy as jnp
from jax.experimental import pallas as pl
from jax.experimental.pallas import tpu as pltpu

EPS = 1e-5
LANE = 128
_VMEM_LIMIT = 48 * 1024 * 1024     # below v7x's 64 MiB physical VMEM


# ---------------------------------------------------------------- kernels ---
def _conv_stats_kernel(x_ref, w_ref, y_ref, sum_ref, sq_ref, acc_ref,
                       *, ksize, stride, th, wo):
    """Implicit-im2col conv tile + per-tile BN statistics.

    x_ref  : (s*s, 1, Hq, Wq, Cin)   bf16  phase-split (space-to-depth) padded
                                           input for one image
    w_ref  : (ksize*ksize, Cin, Cout) bf16 tap-major weights
    y_ref  : (1, th*wo, Cout)        f32   pre-BN conv output tile (row-major)
    sum_ref/sq_ref : (1, 1, 1, Cout) f32   per-tile column sum / sum-of-squares
    acc_ref: (th*wo, Cout)           f32   VMEM accumulator scratch
    """
    hb = pl.program_id(1)
    r0 = pl.multiple_of(hb * th, th)          # first output row of this tile
    cin = x_ref.shape[-1]

    acc_ref[...] = jnp.zeros_like(acc_ref)
    for kh in range(ksize):                   # static tap loop (unrolled)
        for kw in range(ksize):
            ph = (kh % stride) * stride + (kw % stride)   # phase plane
            oh, ow = kh // stride, kw // stride           # offset in phase
            win = x_ref[ph, 0, pl.ds(r0 + oh, th), pl.ds(ow, wo), :]
            a = win.reshape(th * wo, cin)                 # layout-trivial (wo%8==0)
            acc_ref[...] += jnp.dot(a, w_ref[kh * ksize + kw],
                                    preferred_element_type=jnp.float32)

    acc = acc_ref[...]
    y_ref[0] = acc
    sum_ref[0, 0] = jnp.sum(acc, axis=0, keepdims=True)
    sq_ref[0, 0] = jnp.sum(acc * acc, axis=0, keepdims=True)


def _bn_relu_kernel(y_ref, sc_ref, sh_ref, o_ref):
    # h1 = relu(y * scale + shift), written once to HBM in bf16 (conv2 operand)
    h = jnp.maximum(y_ref[0] * sc_ref[0] + sh_ref[0], 0.0)
    o_ref[0] = h.astype(o_ref.dtype)


def _tail_identity_kernel(y_ref, sc_ref, sh_ref, res_ref, o_ref):
    # relu(bn2(y2) + x)
    o_ref[0] = jnp.maximum(y_ref[0] * sc_ref[0] + sh_ref[0] + res_ref[0], 0.0)


def _tail_projection_kernel(y_ref, sc_ref, sh_ref, ysc_ref, scs_ref, shs_ref, o_ref):
    # relu(bn2(y2) + bn_sc(y_sc))
    main = y_ref[0] * sc_ref[0] + sh_ref[0]
    short = ysc_ref[0] * scs_ref[0] + shs_ref[0]
    o_ref[0] = jnp.maximum(main + short, 0.0)


# ------------------------------------------------------------ call helpers --
def _conv_stats(phases, w, *, ksize, stride, ho, wo, th):
    nph, n, hq, wq, cin = phases.shape
    cout = w.shape[-1]
    hb = ho // th
    kernel = functools.partial(_conv_stats_kernel, ksize=ksize, stride=stride,
                               th=th, wo=wo)
    return pl.pallas_call(
        kernel,
        grid=(n, hb),
        in_specs=[
            # whole padded image (all phases) for image i; constant over the
            # inner row-tile axis -> DMA'd once per image
            pl.BlockSpec((nph, 1, hq, wq, cin), lambda i, j: (0, i, 0, 0, 0)),
            pl.BlockSpec((ksize * ksize, cin, cout), lambda i, j: (0, 0, 0)),
        ],
        out_specs=(
            pl.BlockSpec((1, th * wo, cout), lambda i, j: (i, j, 0)),
            pl.BlockSpec((1, 1, 1, cout), lambda i, j: (i, j, 0, 0)),
            pl.BlockSpec((1, 1, 1, cout), lambda i, j: (i, j, 0, 0)),
        ),
        out_shape=(
            jax.ShapeDtypeStruct((n, ho * wo, cout), jnp.float32),
            jax.ShapeDtypeStruct((n, hb, 1, cout), jnp.float32),
            jax.ShapeDtypeStruct((n, hb, 1, cout), jnp.float32),
        ),
        scratch_shapes=[pltpu.VMEM((th * wo, cout), jnp.float32)],
        compiler_params=pltpu.CompilerParams(
            dimension_semantics=("parallel", "parallel"),
            vmem_limit_bytes=_VMEM_LIMIT),
    )(phases, w)


def _per_image_call(kernel, inputs, out_shape):
    """Elementwise pass, one image (row-slab) per grid step."""
    n = out_shape.shape[0]

    def spec(a):
        if a.ndim == 3:
            return pl.BlockSpec((1,) + a.shape[1:], lambda i: (i, 0, 0))
        return pl.BlockSpec(a.shape, lambda i: (0, 0))   # (1, C) scale/shift

    return pl.pallas_call(
        kernel,
        grid=(n,),
        in_specs=[spec(a) for a in inputs],
        out_specs=pl.BlockSpec((1,) + out_shape.shape[1:], lambda i: (i, 0, 0)),
        out_shape=out_shape,
        compiler_params=pltpu.CompilerParams(
            dimension_semantics=("parallel",),
            vmem_limit_bytes=_VMEM_LIMIT),
    )(*inputs)


# ----------------------------------------------------------------- glue -----
def _round_up(x, m):
    return (x + m - 1) // m * m


def _pad_last(a, target):
    c = a.shape[-1]
    if c == target:
        return a
    return jnp.pad(a, [(0, 0)] * (a.ndim - 1) + [(0, target - c)])


def _pack_weights(w, cin_p, cout_p):
    kh, kw, ci, co = w.shape
    w = jnp.pad(w, ((0, 0), (0, 0), (0, cin_p - ci), (0, cout_p - co)))
    return w.reshape(kh * kw, cin_p, cout_p).astype(jnp.bfloat16)


def _space_to_depth(xp, s):
    """(N,Hp,Wp,C) -> (s*s, N, Hp/s, Wp/s, C); phase p=a*s+b holds xp[:, a::s, b::s]."""
    if s == 1:
        return xp[None]
    n, hp, wp, c = xp.shape
    hq, wq = _round_up(hp, s), _round_up(wp, s)
    xp = jnp.pad(xp, ((0, 0), (0, hq - hp), (0, wq - wp), (0, 0)))
    ph = xp.reshape(n, hq // s, s, wq // s, s, c).transpose(2, 4, 0, 1, 3, 5)
    return ph.reshape(s * s, n, hq // s, wq // s, c)


def _pick_th(ho, max_th=8):
    for th in range(min(ho, max_th), 0, -1):
        if ho % th == 0:
            return th
    return 1


def _bn_scale_shift(csum, csq, gamma, beta, count, cp):
    # O(C) finalize of the streamed statistics (negligible wrapper glue):
    # var = E[y^2] - mean^2 ; scale = g*rsqrt(var+eps) ; shift = b - mean*scale
    total = jnp.sum(csum[:, :, 0, :], axis=(0, 1))
    total_sq = jnp.sum(csq[:, :, 0, :], axis=(0, 1))
    mean = total / count
    var = jnp.maximum(total_sq / count - mean * mean, 0.0)
    scale = _pad_last(gamma, cp) * jax.lax.rsqrt(var + EPS)
    shift = _pad_last(beta, cp) - mean * scale
    return (scale.reshape(1, cp).astype(jnp.float32),
            shift.reshape(1, cp).astype(jnp.float32))


def basic_block_forward(x_nhwc, params, stride):
    """Pallas implementation of BasicBlock.forward (training-mode BN)."""
    n, h, w, cin = x_nhwc.shape
    cout = params["w1"].shape[-1]
    cin_p = _round_up(cin, LANE)
    cout_p = _round_up(cout, LANE)
    ho = (h - 1) // stride + 1
    wo = (w - 1) // stride + 1
    m = n * ho * wo
    th = _pick_th(ho)

    x_cp = _pad_last(x_nhwc, cin_p)                                   # f32

    # ---- conv1 (3x3, stride) + streamed BN1 stats ----
    xp = jnp.pad(x_cp, ((0, 0), (1, 1), (1, 1), (0, 0))).astype(jnp.bfloat16)
    y1, s1, q1 = _conv_stats(_space_to_depth(xp, stride),
                             _pack_weights(params["w1"], cin_p, cout_p),
                             ksize=3, stride=stride, ho=ho, wo=wo, th=th)
    sc1, sh1 = _bn_scale_shift(s1, q1, params["g1"], params["b1"], m, cout_p)

    # ---- BN1 + ReLU (h1 stored once in HBM, bf16) ----
    h1 = _per_image_call(_bn_relu_kernel, [y1, sc1, sh1],
                         jax.ShapeDtypeStruct((n, ho * wo, cout_p), jnp.bfloat16))
    # TODO(synk): fuse BN1+ReLU with conv2 (halo rows kept in VMEM scratch) to
    # remove this remaining HBM round-trip of h1.

    # ---- conv2 (3x3, stride 1) + streamed BN2 stats ----
    h1p = jnp.pad(h1.reshape(n, ho, wo, cout_p), ((0, 0), (1, 1), (1, 1), (0, 0)))
    y2, s2, q2 = _conv_stats(_space_to_depth(h1p, 1),
                             _pack_weights(params["w2"], cout_p, cout_p),
                             ksize=3, stride=1, ho=ho, wo=wo, th=th)
    sc2, sh2 = _bn_scale_shift(s2, q2, params["g2"], params["b2"], m, cout_p)

    # ---- shortcut + fused BN2 / add / ReLU tail ----
    out_sds = jax.ShapeDtypeStruct((n, ho * wo, cout_p), jnp.float32)
    if stride != 1 or cin != cout:
        # projection shortcut: 1x1 stride-s conv + BN (reuses the conv kernel)
        xs = x_cp[:, ::stride, ::stride, :].astype(jnp.bfloat16)      # (n,ho,wo,cin_p)
        ysc, ss, qs = _conv_stats(xs[None],
                                  _pack_weights(params["wsc"], cin_p, cout_p),
                                  ksize=1, stride=1, ho=ho, wo=wo, th=th)
        scs, shs = _bn_scale_shift(ss, qs, params["gsc"], params["bsc"], m, cout_p)
        out = _per_image_call(_tail_projection_kernel,
                              [y2, sc2, sh2, ysc, scs, shs], out_sds)
    else:
        res = x_cp.reshape(n, ho * wo, cout_p)
        out = _per_image_call(_tail_identity_kernel, [y2, sc2, sh2, res], out_sds)

    return out.reshape(n, ho, wo, cout_p)[..., :cout]


# ------------------------------------------------------- pure-JAX reference -
def basic_block_ref(x, params, stride):
    def conv(x, w, s, pad):
        return jax.lax.conv_general_dilated(
            x, w, (s, s), ((pad, pad), (pad, pad)),
            dimension_numbers=("NHWC", "HWIO", "NHWC"))

    def bn(y, g, b):
        mean = y.mean(axis=(0, 1, 2))
        var = ((y - mean) ** 2).mean(axis=(0, 1, 2))
        return (y - mean) / jnp.sqrt(var + EPS) * g + b

    out = jax.nn.relu(bn(conv(x, params["w1"], stride, 1), params["g1"], params["b1"]))
    out = bn(conv(out, params["w2"], 1, 1), params["g2"], params["b2"])
    cin, cout = x.shape[-1], params["w1"].shape[-1]
    if stride != 1 or cin != cout:
        sc = bn(conv(x, params["wsc"], stride, 0), params["gsc"], params["bsc"])
    else:
        sc = x
    return jax.nn.relu(out + sc)


# ------------------------------------------------------------------- main ---
if __name__ == "__main__":
    key = jax.random.PRNGKey(0)
    kx, k1, k2, k3, k4, k5, k6, k7, k8, k9 = jax.random.split(key, 10)

    N, H, W = 2, 16, 16
    in_planes, planes, stride = 4, 8, 2   # projection-shortcut path

    x = jax.random.normal(kx, (N, H, W, in_planes), jnp.float32)
    params = dict(
        w1=0.3 * jax.random.normal(k1, (3, 3, in_planes, planes), jnp.float32),
        g1=1.0 + 0.1 * jax.random.normal(k2, (planes,), jnp.float32),
        b1=0.1 * jax.random.normal(k3, (planes,), jnp.float32),
        w2=0.3 * jax.random.normal(k4, (3, 3, planes, planes), jnp.float32),
        g2=1.0 + 0.1 * jax.random.normal(k5, (planes,), jnp.float32),
        b2=0.1 * jax.random.normal(k6, (planes,), jnp.float32),
        wsc=0.3 * jax.random.normal(k7, (1, 1, in_planes, planes), jnp.float32),
        gsc=1.0 + 0.1 * jax.random.normal(k8, (planes,), jnp.float32),
        bsc=0.1 * jax.random.normal(k9, (planes,), jnp.float32),
    )

    # Tolerance is set for bf16 MXU operands (f32 accumulation / BN math).
    TOL = 3e-2

    out = jax.block_until_ready(basic_block_forward(x, params, stride))
    ref = basic_block_ref(x, params, stride)
    assert out.shape == (N, H // stride, W // stride, planes)
    assert jnp.allclose(out, ref, atol=TOL, rtol=TOL), float(jnp.abs(out - ref).max())

    # identity-shortcut path (stride=1, in_planes == planes) -- exercises the
    # multi-row-tile grid (hb > 1) as well.
    params_id = dict(
        w1=0.3 * jax.random.normal(k1, (3, 3, planes, planes), jnp.float32),
        g1=params["g1"], b1=params["b1"],
        w2=params["w2"], g2=params["g2"], b2=params["b2"],
    )
    x2 = jax.random.normal(kx, (N, H, W, planes), jnp.float32)
    out2 = jax.block_until_ready(basic_block_forward(x2, params_id, 1))
    ref2 = basic_block_ref(x2, params_id, 1)
    assert out2.shape == (N, H, W, planes)
    assert jnp.allclose(out2, ref2, atol=TOL, rtol=TOL), float(jnp.abs(out2 - ref2).max())

    print("KERNEL_OK")
</pallas_src>

<mosaic_0001>
module attributes {stable_mosaic.version = 11 : i64} {
  func.func @_conv_stats_kernel(%arg0: i32, %arg1: i32, %arg2: memref<4x1x9x9x128xbf16, #tpu.memory_space<vmem>>, %arg3: memref<9x128x128xbf16, #tpu.memory_space<vmem>>, %arg4: memref<1x64x128xf32, #tpu.memory_space<vmem>>, %arg5: memref<1x1x1x128xf32, #tpu.memory_space<vmem>>, %arg6: memref<1x1x1x128xf32, #tpu.memory_space<vmem>>, %arg7: memref<64x128xf32, #tpu.memory_space<vmem>>) attributes {dimension_semantics = [#tpu.dimension_semantics<parallel>, #tpu.dimension_semantics<parallel>], iteration_bounds = array<i64: 2, 1>, scalar_prefetch = 0 : i64, scratch_operands = 1 : i64, tpu.core_type = #tpu.core_type<tc>, window_params = [{transform_indices = @transform_0, window_bounds = array<i64: 4, 1, 9, 9, 128>}, {pipeline_mode = #tpu.pipeline_mode<synchronous>, transform_indices = @transform_1, window_bounds = array<i64: 9, 128, 128>}, {transform_indices = @transform_2, window_bounds = array<i64: 1, 64, 128>}, {transform_indices = @transform_3, window_bounds = array<i64: 1, 1, 1, 128>}, {transform_indices = @transform_4, window_bounds = array<i64: 1, 1, 1, 128>}]} {
    %c8_i32 = arith.constant 8 : i32
    %0 = arith.muli %arg1, %c8_i32 : i32
    %1 = tpu.assume_multiple %0, 8 : i32
    %cst = arith.constant 0.000000e+00 : f32
    %2 = vector.broadcast %cst : f32 to vector<64x128xf32>
    %c0 = arith.constant 0 : index
    %c0_0 = arith.constant 0 : index
    %3 = vector.load %arg7[%c0, %c0_0] : memref<64x128xf32, #tpu.memory_space<vmem>>, vector<64x128xf32>
    tpu.vector_store %arg7[%c0, %c0_0], %2 {strides = array<i32>} : memref<64x128xf32, #tpu.memory_space<vmem>>, vector<64x128xf32>,
    %c0_i32 = arith.constant 0 : i32
    %4 = arith.addi %1, %c0_i32 : i32
    %c0_1 = arith.constant 0 : index
    %c0_2 = arith.constant 0 : index
    %5 = arith.index_cast %4 : i32 to index
    %c0_3 = arith.constant 0 : index
    %c0_4 = arith.constant 0 : index
    %6 = vector.load %arg2[%c0_1, %c0_2, %5, %c0_3, %c0_4] : memref<4x1x9x9x128xbf16, #tpu.memory_space<vmem>>, vector<1x1x8x8x128xbf16>
    %7 = vector.shape_cast %6 : vector<1x1x8x8x128xbf16> to vector<8x8x128xbf16>
    %8 = vector.shape_cast %7 : vector<8x8x128xbf16> to vector<64x128xbf16>
    %c0_5 = arith.constant 0 : index
    %c0_6 = arith.constant 0 : index
    %9 = vector.load %arg7[%c0_5, %c0_6] : memref<64x128xf32, #tpu.memory_space<vmem>>, vector<64x128xf32>
    %c0_7 = arith.constant 0 : index
    %c0_8 = arith.constant 0 : index
    %c0_9 = arith.constant 0 : index
    %10 = vector.load %arg3[%c0_7, %c0_8, %c0_9] : memref<9x128x128xbf16, #tpu.memory_space<vmem>>, vector<1x128x128xbf16>
    %11 = vector.shape_cast %10 : vector<1x128x128xbf16> to vector<128x128xbf16>
    %cst_10 = arith.constant dense<0.000000e+00> : vector<64x128xf32>
    %12 = tpu.matmul %8, %11, %cst_10 {dimension_numbers = #tpu.dot_dimension_numbers<[1], [0], [0], [1], [0, 0, 1, 1], [], []>} : vector<64x128xbf16>, vector<128x128xbf16>, vector<64x128xf32> -> vector<64x128xf32>
    %13 = arith.addf %9, %12 : vector<64x128xf32>
    %c0_11 = arith.constant 0 : index
    %c0_12 = arith.constant 0 : index
    %14 = vector.load %arg7[%c0_11, %c0_12] : memref<64x128xf32, #tpu.memory_space<vmem>>, vector<64x128xf32>
    tpu.vector_store %arg7[%c0_11, %c0_12], %13 {strides = array<i32>} : memref<64x128xf32, #tpu.memory_space<vmem>>, vector<64x128xf32>,
    %c0_i32_13 = arith.constant 0 : i32
    %15 = arith.addi %1, %c0_i32_13 : i32
    %c1 = arith.constant 1 : index
    %c0_14 = arith.constant 0 : index
    %16 = arith.index_cast %15 : i32 to index
    %c0_15 = arith.constant 0 : index
    %c0_16 = arith.constant 0 : index
    %17 = vector.load %arg2[%c1, %c0_14, %16, %c0_15, %c0_16] : memref<4x1x9x9x128xbf16, #tpu.memory_space<vmem>>, vector<1x1x8x8x128xbf16>
    %18 = vector.shape_cast %17 : vector<1x1x8x8x128xbf16> to vector<8x8x128xbf16>
    %19 = vector.shape_cast %18 : vector<8x8x128xbf16> to vector<64x128xbf16>
    %c0_17 = arith.constant 0 : index
    %c0_18 = arith.constant 0 : index
    %20 = vector.load %arg7[%c0_17, %c0_18] : memref<64x128xf32, #tpu.memory_space<vmem>>, vector<64x128xf32>
    %c1_19 = arith.constant 1 : index
    %c0_20 = arith.constant 0 : index
    %c0_21 = arith.constant 0 : index
    %21 = vector.load %arg3[%c1_19, %c0_20, %c0_21] : memref<9x128x128xbf16, #tpu.memory_space<vmem>>, vector<1x128x128xbf16>
    %22 = vector.shape_cast %21 : vector<1x128x128xbf16> to vector<128x128xbf16>
    %cst_22 = arith.constant dense<0.000000e+00> : vector<64x128xf32>
    %23 = tpu.matmul %19, %22, %cst_22 {dimension_numbers = #tpu.dot_dimension_numbers<[1], [0], [0], [1], [0, 0, 1, 1], [], []>} : vector<64x128xbf16>, vector<128x128xbf16>, vector<64x128xf32> -> vector<64x128xf32>
    %24 = arith.addf %20, %23 : vector<64x128xf32>
    %c0_23 = arith.constant 0 : index
    %c0_24 = arith.constant 0 : index
    %25 = vector.load %arg7[%c0_23, %c0_24] : memref<64x128xf32, #tpu.memory_space<vmem>>, vector<64x128xf32>
    tpu.vector_store %arg7[%c0_23, %c0_24], %24 {strides = array<i32>} : memref<64x128xf32, #tpu.memory_space<vmem>>, vector<64x128xf32>,
    %c0_i32_25 = arith.constant 0 : i32
    %26 = arith.addi %1, %c0_i32_25 : i32
    %c0_26 = arith.constant 0 : index
    %c0_27 = arith.constant 0 : index
    %27 = arith.index_cast %26 : i32 to index
    %c1_28 = arith.constant 1 : index
    %c0_29 = arith.constant 0 : index
    %28 = vector.load %arg2[%c0_26, %c0_27, %27, %c1_28, %c0_29] : memref<4x1x9x9x128xbf16, #tpu.memory_space<vmem>>, vector<1x1x8x8x128xbf16>
    %29 = vector.shape_cast %28 : vector<1x1x8x8x128xbf16> to vector<8x8x128xbf16>
    %30 = vector.shape_cast %29 : vector<8x8x128xbf16> to vector<64x128xbf16>
    %c0_30 = arith.constant 0 : index
    %c0_31 = arith.constant 0 : index
    %31 = vector.load %arg7[%c0_30, %c0_31] : memref<64x128xf32, #tpu.memory_space<vmem>>, vector<64x128xf32>
    %c2 = arith.constant 2 : index
    %c0_32 = arith.constant 0 : index
    %c0_33 = arith.constant 0 : index
    %32 = vector.load %arg3[%c2, %c0_32, %c0_33] : memref<9x128x128xbf16, #tpu.memory_space<vmem>>, vector<1x128x128xbf16>
    %33 = vector.shape_cast %32 : vector<1x128x128xbf16> to vector<128x128xbf16>
    %cst_34 = arith.constant dense<0.000000e+00> : vector<64x128xf32>
    %34 = tpu.matmul %30, %33, %cst_34 {dimension_numbers = #tpu.dot_dimension_numbers<[1], [0], [0], [1], [0, 0, 1, 1], [], []>} : vector<64x128xbf16>, vector<128x128xbf16>, vector<64x128xf32> -> vector<64x128xf32>
    %35 = arith.addf %31, %34 : vector<64x128xf32>
    %c0_35 = arith.constant 0 : index
    %c0_36 = arith.constant 0 : index
    %36 = vector.load %arg7[%c0_35, %c0_36] : memref<64x128xf32, #tpu.memory_space<vmem>>, vector<64x128xf32>
    tpu.vector_store %arg7[%c0_35, %c0_36], %35 {strides = array<i32>} : memref<64x128xf32, #tpu.memory_space<vmem>>, vector<64x128xf32>,
    %c0_i32_37 = arith.constant 0 : i32
    %37 = arith.addi %1, %c0_i32_37 : i32
    %c2_38 = arith.constant 2 : index
    %c0_39 = arith.constant 0 : index
    %38 = arith.index_cast %37 : i32 to index
    %c0_40 = arith.constant 0 : index
    %c0_41 = arith.constant 0 : index
    %39 = vector.load %arg2[%c2_38, %c0_39, %38, %c0_40, %c0_41] : memref<4x1x9x9x128xbf16, #tpu.memory_space<vmem>>, vector<1x1x8x8x128xbf16>
    %40 = vector.shape_cast %39 : vector<1x1x8x8x128xbf16> to vector<8x8x128xbf16>
    %41 = vector.shape_cast %40 : vector<8x8x128xbf16> to vector<64x128xbf16>
    %c0_42 = arith.constant 0 : index
    %c0_43 = arith.constant 0 : index
    %42 = vector.load %arg7[%c0_42, %c0_43] : memref<64x128xf32, #tpu.memory_space<vmem>>, vector<64x128xf32>
    %c3 = arith.constant 3 : index
    %c0_44 = arith.constant 0 : index
    %c0_45 = arith.constant 0 : index
    %43 = vector.load %arg3[%c3, %c0_44, %c0_45] : memref<9x128x128xbf16, #tpu.memory_space<vmem>>, vector<1x128x128xbf16>
    %44 = vector.shape_cast %43 : vector<1x128x128xbf16> to vector<128x128xbf16>
    %cst_46 = arith.constant dense<0.000000e+00> : vector<64x128xf32>
    %45 = tpu.matmul %41, %44, %cst_46 {dimension_numbers = #tpu.dot_dimension_numbers<[1], [0], [0], [1], [0, 0, 1, 1], [], []>} : vector<64x128xbf16>, vector<128x128xbf16>, vector<64x128xf32> -> vector<64x128xf32>
    %46 = arith.addf %42, %45 : vector<64x128xf32>
    %c0_47 = arith.constant 0 : index
    %c0_48 = arith.constant 0 : index
    %47 = vector.load %arg7[%c0_47, %c0_48] : memref<64x128xf32, #tpu.memory_space<vmem>>, vector<64x128xf32>
    tpu.vector_store %arg7[%c0_47, %c0_48], %46 {strides = array<i32>} : memref<64x128xf32, #tpu.memory_space<vmem>>, vector<64x128xf32>,
    %c0_i32_49 = arith.constant 0 : i32
    %48 = arith.addi %1, %c0_i32_49 : i32
    %c3_50 = arith.constant 3 : index
    %c0_51 = arith.constant 0 : index
    %49 = arith.index_cast %48 : i32 to index
    %c0_52 = arith.constant 0 : index
    %c0_53 = arith.constant 0 : index
    %50 = vector.load %arg2[%c3_50, %c0_51, %49, %c0_52, %c0_53] : memref<4x1x9x9x128xbf16, #tpu.memory_space<vmem>>, vector<1x1x8x8x128xbf16>
    %51 = vector.shape_cast %50 : vector<1x1x8x8x128xbf16> to vector<8x8x128xbf16>
    %52 = vector.shape_cast %51 : vector<8x8x128xbf16> to vector<64x128xbf16>
    %c0_54 = arith.constant 0 : index
    %c0_55 = arith.constant 0 : index
    %53 = vector.load %arg7[%c0_54, %c0_55] : memref<64x128xf32, #tpu.memory_space<vmem>>, vector<64x128xf32>
    %c4 = arith.constant 4 : index
    %c0_56 = arith.constant 0 : index
    %c0_57 = arith.constant 0 : index
    %54 = vector.load %arg3[%c4, %c0_56, %c0_57] : memref<9x128x128xbf16, #tpu.memory_space<vmem>>, vector<1x128x128xbf16>
    %55 = vector.shape_cast %54 : vector<1x128x128xbf16> to vector<128x128xbf16>
    %cst_58 = arith.constant dense<0.000000e+00> : vector<64x128xf32>
    %56 = tpu.matmul %52, %55, %cst_58 {dimension_numbers = #tpu.dot_dimension_numbers<[1], [0], [0], [1], [0, 0, 1, 1], [], []>} : vector<64x128xbf16>, vector<128x128xbf16>, vector<64x128xf32> -> vector<64x128xf32>
    %57 = arith.addf %53, %56 : vector<64x128xf32>
    %c0_59 = arith.constant 0 : index
    %c0_60 = arith.constant 0 : index
    %58 = vector.load %arg7[%c0_59, %c0_60] : memref<64x128xf32, #tpu.memory_space<vmem>>, vector<64x128xf32>
    tpu.vector_store %arg7[%c0_59, %c0_60], %57 {strides = array<i32>} : memref<64x128xf32, #tpu.memory_space<vmem>>, vector<64x128xf32>,
    %c0_i32_61 = arith.constant 0 : i32
    %59 = arith.addi %1, %c0_i32_61 : i32
    %c2_62 = arith.constant 2 : index
    %c0_63 = arith.constant 0 : index
    %60 = arith.index_cast %59 : i32 to index
    %c1_64 = arith.constant 1 : index
    %c0_65 = arith.constant 0 : index
    %61 = vector.load %arg2[%c2_62, %c0_63, %60, %c1_64, %c0_65] : memref<4x1x9x9x128xbf16, #tpu.memory_space<vmem>>, vector<1x1x8x8x128xbf16>
    %62 = vector.shape_cast %61 : vector<1x1x8x8x128xbf16> to vector<8x8x128xbf16>
    %63 = vector.shape_cast %62 : vector<8x8x128xbf16> to vector<64x128xbf16>
    %c0_66 = arith.constant 0 : index
    %c0_67 = arith.constant 0 : index
    %64 = vector.load %arg7[%c0_66, %c0_67] : memref<64x128xf32, #tpu.memory_space<vmem>>, vector<64x128xf32>
    %c5 = arith.constant 5 : index
    %c0_68 = arith.constant 0 : index
    %c0_69 = arith.constant 0 : index
    %65 = vector.load %arg3[%c5, %c0_68, %c0_69] : memref<9x128x128xbf16, #tpu.memory_space<vmem>>, vector<1x128x128xbf16>
    %66 = vector.shape_cast %65 : vector<1x128x128xbf16> to vector<128x128xbf16>
    %cst_70 = arith.constant dense<0.000000e+00> : vector<64x128xf32>
    %67 = tpu.matmul %63, %66, %cst_70 {dimension_numbers = #tpu.dot_dimension_numbers<[1], [0], [0], [1], [0, 0, 1, 1], [], []>} : vector<64x128xbf16>, vector<128x128xbf16>, vector<64x128xf32> -> vector<64x128xf32>
    %68 = arith.addf %64, %67 : vector<64x128xf32>
    %c0_71 = arith.constant 0 : index
    %c0_72 = arith.constant 0 : index
    %69 = vector.load %arg7[%c0_71, %c0_72] : memref<64x128xf32, #tpu.memory_space<vmem>>, vector<64x128xf32>
    tpu.vector_store %arg7[%c0_71, %c0_72], %68 {strides = array<i32>} : memref<64x128xf32, #tpu.memory_space<vmem>>, vector<64x128xf32>,
    %c1_i32 = arith.constant 1 : i32
    %70 = arith.addi %1, %c1_i32 : i32
    %c0_73 = arith.constant 0 : index
    %c0_74 = arith.constant 0 : index
    %71 = arith.index_cast %70 : i32 to index
    %c0_75 = arith.constant 0 : index
    %c0_76 = arith.constant 0 : index
    %72 = vector.load %arg2[%c0_73, %c0_74, %71, %c0_75, %c0_76] : memref<4x1x9x9x128xbf16, #tpu.memory_space<vmem>>, vector<1x1x8x8x128xbf16>
    %73 = vector.shape_cast %72 : vector<1x1x8x8x128xbf16> to vector<8x8x128xbf16>
    %74 = vector.shape_cast %73 : vector<8x8x128xbf16> to vector<64x128xbf16>
    %c0_77 = arith.constant 0 : index
    %c0_78 = arith.constant 0 : index
    %75 = vector.load %arg7[%c0_77, %c0_78] : memref<64x128xf32, #tpu.memory_space<vmem>>, vector<64x128xf32>
    %c6 = arith.constant 6 : index
    %c0_79 = arith.constant 0 : index
    %c0_80 = arith.constant 0 : index
    %76 = vector.load %arg3[%c6, %c0_79, %c0_80] : memref<9x128x128xbf16, #tpu.memory_space<vmem>>, vector<1x128x128xbf16>
    %77 = vector.shape_cast %76 : vector<1x128x128xbf16> to vector<128x128xbf16>
    %cst_81 = arith.constant dense<0.000000e+00> : vector<64x128xf32>
    %78 = tpu.matmul %74, %77, %cst_81 {dimension_numbers = #tpu.dot_dimension_numbers<[1], [0], [0], [1], [0, 0, 1, 1], [], []>} : vector<64x128xbf16>, vector<128x128xbf16>, vector<64x128xf32> -> vector<64x128xf32>
    %79 = arith.addf %75, %78 : vector<64x128xf32>
    %c0_82 = arith.constant 0 : index
    %c0_83 = arith.constant 0 : index
    %80 = vector.load %arg7[%c0_82, %c0_83] : memref<64x128xf32, #tpu.memory_space<vmem>>, vector<64x128xf32>
    tpu.vector_store %arg7[%c0_82, %c0_83], %79 {strides = array<i32>} : memref<64x128xf32, #tpu.memory_space<vmem>>, vector<64x128xf32>,
    %c1_i32_84 = arith.constant 1 : i32
    %81 = arith.addi %1, %c1_i32_84 : i32
    %c1_85 = arith.constant 1 : index
    %c0_86 = arith.constant 0 : index
    %82 = arith.index_cast %81 : i32 to index
    %c0_87 = arith.constant 0 : index
    %c0_88 = arith.constant 0 : index
    %83 = vector.load %arg2[%c1_85, %c0_86, %82, %c0_87, %c0_88] : memref<4x1x9x9x128xbf16, #tpu.memory_space<vmem>>, vector<1x1x8x8x128xbf16>
    %84 = vector.shape_cast %83 : vector<1x1x8x8x128xbf16> to vector<8x8x128xbf16>
    %85 = vector.shape_cast %84 : vector<8x8x128xbf16> to vector<64x128xbf16>
    %c0_89 = arith.constant 0 : index
    %c0_90 = arith.constant 0 : index
    %86 = vector.load %arg7[%c0_89, %c0_90] : memref<64x128xf32, #tpu.memory_space<vmem>>, vector<64x128xf32>
    %c7 = arith.constant 7 : index
    %c0_91 = arith.constant 0 : index
    %c0_92 = arith.constant 0 : index
    %87 = vector.load %arg3[%c7, %c0_91, %c0_92] : memref<9x128x128xbf16, #tpu.memory_space<vmem>>, vector<1x128x128xbf16>
    %88 = vector.shape_cast %87 : vector<1x128x128xbf16> to vector<128x128xbf16>
    %cst_93 = arith.constant dense<0.000000e+00> : vector<64x128xf32>
    %89 = tpu.matmul %85, %88, %cst_93 {dimension_numbers = #tpu.dot_dimension_numbers<[1], [0], [0], [1], [0, 0, 1, 1], [], []>} : vector<64x128xbf16>, vector<128x128xbf16>, vector<64x128xf32> -> vector<64x128xf32>
    %90 = arith.addf %86, %89 : vector<64x128xf32>
    %c0_94 = arith.constant 0 : index
    %c0_95 = arith.constant 0 : index
    %91 = vector.load %arg7[%c0_94, %c0_95] : memref<64x128xf32, #tpu.memory_space<vmem>>, vector<64x128xf32>
    tpu.vector_store %arg7[%c0_94, %c0_95], %90 {strides = array<i32>} : memref<64x128xf32, #tpu.memory_space<vmem>>, vector<64x128xf32>,
    %c1_i32_96 = arith.constant 1 : i32
    %92 = arith.addi %1, %c1_i32_96 : i32
    %c0_97 = arith.constant 0 : index
    %c0_98 = arith.constant 0 : index
    %93 = arith.index_cast %92 : i32 to index
    %c1_99 = arith.constant 1 : index
    %c0_100 = arith.constant 0 : index
    %94 = vector.load %arg2[%c0_97, %c0_98, %93, %c1_99, %c0_100] : memref<4x1x9x9x128xbf16, #tpu.memory_space<vmem>>, vector<1x1x8x8x128xbf16>
    %95 = vector.shape_cast %94 : vector<1x1x8x8x128xbf16> to vector<8x8x128xbf16>
    %96 = vector.shape_cast %95 : vector<8x8x128xbf16> to vector<64x128xbf16>
    %c0_101 = arith.constant 0 : index
    %c0_102 = arith.constant 0 : index
    %97 = vector.load %arg7[%c0_101, %c0_102] : memref<64x128xf32, #tpu.memory_space<vmem>>, vector<64x128xf32>
    %c8 = arith.constant 8 : index
    %c0_103 = arith.constant 0 : index
    %c0_104 = arith.constant 0 : index
    %98 = vector.load %arg3[%c8, %c0_103, %c0_104] : memref<9x128x128xbf16, #tpu.memory_space<vmem>>, vector<1x128x128xbf16>
    %99 = vector.shape_cast %98 : vector<1x128x128xbf16> to vector<128x128xbf16>
    %cst_105 = arith.constant dense<0.000000e+00> : vector<64x128xf32>
    %100 = tpu.matmul %96, %99, %cst_105 {dimension_numbers = #tpu.dot_dimension_numbers<[1], [0], [0], [1], [0, 0, 1, 1], [], []>} : vector<64x128xbf16>, vector<128x128xbf16>, vector<64x128xf32> -> vector<64x128xf32>
    %101 = arith.addf %97, %100 : vector<64x128xf32>
    %c0_106 = arith.constant 0 : index
    %c0_107 = arith.constant 0 : index
    %102 = vector.load %arg7[%c0_106, %c0_107] : memref<64x128xf32, #tpu.memory_space<vmem>>, vector<64x128xf32>
    tpu.vector_store %arg7[%c0_106, %c0_107], %101 {strides = array<i32>} : memref<64x128xf32, #tpu.memory_space<vmem>>, vector<64x128xf32>,
    %c0_108 = arith.constant 0 : index
    %c0_109 = arith.constant 0 : index
    %103 = vector.load %arg7[%c0_108, %c0_109] : memref<64x128xf32, #tpu.memory_space<vmem>>, vector<64x128xf32>
    %c0_110 = arith.constant 0 : index
    %c0_111 = arith.constant 0 : index
    %c0_112 = arith.constant 0 : index
    %104 = vector.load %arg4[%c0_110, %c0_111, %c0_112] : memref<1x64x128xf32, #tpu.memory_space<vmem>>, vector<1x64x128xf32>
    %105 = vector.shape_cast %104 : vector<1x64x128xf32> to vector<64x128xf32>
    %106 = vector.shape_cast %103 : vector<64x128xf32> to vector<1x64x128xf32>
    tpu.vector_store %arg4[%c0_110, %c0_111, %c0_112], %106 {strides = array<i32>} : memref<1x64x128xf32, #tpu.memory_space<vmem>>, vector<1x64x128xf32>,
    %cst_113 = arith.constant dense<0.000000e+00> : vector<128xf32>
    %107 = vector.multi_reduction <add>, %103, %cst_113 [0] : vector<64x128xf32> to vector<128xf32>
    %108 = vector.shape_cast %107 : vector<128xf32> to vector<1x128xf32>
    %c0_114 = arith.constant 0 : index
    %c0_115 = arith.constant 0 : index
    %c0_116 = arith.constant 0 : index
    %c0_117 = arith.constant 0 : index
    %109 = vector.load %arg5[%c0_114, %c0_115, %c0_116, %c0_117] : memref<1x1x1x128xf32, #tpu.memory_space<vmem>>, vector<1x1x1x128xf32>
    %110 = vector.shape_cast %109 : vector<1x1x1x128xf32> to vector<1x128xf32>
    %111 = vector.shape_cast %108 : vector<1x128xf32> to vector<1x1x1x128xf32>
    tpu.vector_store %arg5[%c0_114, %c0_115, %c0_116, %c0_117], %111 {strides = array<i32>} : memref<1x1x1x128xf32, #tpu.memory_space<vmem>>, vector<1x1x1x128xf32>,
    %112 = arith.mulf %103, %103 : vector<64x128xf32>
    %cst_118 = arith.constant dense<0.000000e+00> : vector<128xf32>
    %113 = vector.multi_reduction <add>, %112, %cst_118 [0] : vector<64x128xf32> to vector<128xf32>
    %114 = vector.shape_cast %113 : vector<128xf32> to vector<1x128xf32>
    %c0_119 = arith.constant 0 : index
    %c0_120 = arith.constant 0 : index
    %c0_121 = arith.constant 0 : index
    %c0_122 = arith.constant 0 : index
    %115 = vector.load %arg6[%c0_119, %c0_120, %c0_121, %c0_122] : memref<1x1x1x128xf32, #tpu.memory_space<vmem>>, vector<1x1x1x128xf32>
    %116 = vector.shape_cast %115 : vector<1x1x1x128xf32> to vector<1x128xf32>
    %117 = vector.shape_cast %114 : vector<1x128xf32> to vector<1x1x1x128xf32>
    tpu.vector_store %arg6[%c0_119, %c0_120, %c0_121, %c0_122], %117 {strides = array<i32>} : memref<1x1x1x128xf32, #tpu.memory_space<vmem>>, vector<1x1x1x128xf32>,
    return
  }
  func.func @transform_0(%arg0: i32, %arg1: i32) -> (i32, i32, i32, i32, i32) {
    %c0_i32 = arith.constant 0 : i32
    %c0_i32_0 = arith.constant 0 : i32
    %c0_i32_1 = arith.constant 0 : i32
    %c0_i32_2 = arith.constant 0 : i32
    %c0_i32_3 = arith.constant 0 : i32
    return %c0_i32, %arg0, %c0_i32_0, %c0_i32_1, %c0_i32_2 : i32, i32, i32, i32, i32
  }
  func.func @transform_1(%arg0: i32, %arg1: i32) -> (i32, i32, i32) {
    %c0_i32 = arith.constant 0 : i32
    %c0_i32_0 = arith.constant 0 : i32
    %c0_i32_1 = arith.constant 0 : i32
    %c0_i32_2 = arith.constant 0 : i32
    return %c0_i32, %c0_i32_0, %c0_i32_1 : i32, i32, i32
  }
  func.func @transform_2(%arg0: i32, %arg1: i32) -> (i32, i32, i32) {
    %c0_i32 = arith.constant 0 : i32
    %c0_i32_0 = arith.constant 0 : i32
    return %arg0, %arg1, %c0_i32 : i32, i32, i32
  }
  func.func @transform_3(%arg0: i32, %arg1: i32) -> (i32, i32, i32, i32) {
    %c0_i32 = arith.constant 0 : i32
    %c0_i32_0 = arith.constant 0 : i32
    %c0_i32_1 = arith.constant 0 : i32
    return %arg0, %arg1, %c0_i32, %c0_i32_0 : i32, i32, i32, i32
  }
  func.func @transform_4(%arg0: i32, %arg1: i32) -> (i32, i32, i32, i32) {
    %c0_i32 = arith.constant 0 : i32
    %c0_i32_0 = arith.constant 0 : i32
    %c0_i32_1 = arith.constant 0 : i32
    return %arg0, %arg1, %c0_i32, %c0_i32_0 : i32, i32, i32, i32
  }
}

</mosaic_0001>

<bundles_post_ra>
// kernel: tpu_custom_call.1
= control target key start
LH: loop header
LB: loop body
LE: loop exit
PB: predicated region body
PF: predicated region fallthrough
CT: control target
= control target key end

     0   :  { %10 = vsyncpa [#allocation5], 0  ;;  %s4503_s0 = inlined_call_operand.vmem [shape: bf16[4,2,9,9,128], index: 0, kind: input, shape index: {}]   ;;  %s4504_s1 = inlined_call_operand.vmem [shape: bf16[9,128,128], index: 1, kind: input, shape index: {}]   ;;  %s4505_s2 = inlined_call_operand.hbm [shape: f32[2,64,128], index: 2, kind: output, shape index: {0}]   ;;  %s4506_s3 = inlined_call_operand.hbm [shape: f32[2,1,1,128], index: 3, kind: output, shape index: {1}]   ;;  %s4507_s4 = inlined_call_operand.hbm [shape: f32[2,1,1,128], index: 4, kind: output, shape index: {2}]  }
   0x1   :  { %12 = vsyncpa [#allocation5 + $0x1], 0 }
   0x2   :  { %13 = vsyncpa [#allocation7], 0 }
   0x3   :  { %15 = vsyncpa [#allocation7 + $0x1], 0  ;;  %s3854_s15 = smov 0   ;;  %s3856_s16 = smov 0  }
   0x4   :  { %s3858_s17 = smov 0   ;;  %s3860_s18 = smov 0  }
   0x5   :  { %s3862_s19 = smov 0   ;;  %s3864_s20 = smov 0  }
   0x6 LB: > { %s2861_s21 = sadd.s32 4294967295, %s3822_s20   ;;  %s4508_s22 = sadd.s32 4294967294, %s3822_s20   ;;  %s3822_s20 = sphi %s3864_s20, %s21_s20   ;;  %s3818_s19 = sphi %s3862_s19, %s4532_s19   ;;  %s3814_s18 = sphi %s3860_s18, %s4531_s18   ;;  %s3810_s17 = sphi %s3858_s17, %s4530_s17   ;;  %s3806_s16 = sphi %s3856_s16, %s4529_s16   ;;  %s3802_s15 = sphi %s3854_s15, %s4528_s15  }
   0x7   : > { %s33_s23 = sadd.s32 1, %s3818_s19  ;;  %s40_s24 = sadd.s32 1, %s3810_s17 }
   0x8   : > { %p35_p0 = scmp.ge.s32.totalorder %s33_s23, 2  ;;  %p47_p1 = scmp.ne.s32.totalorder %s3810_s17, %s3806_s16 }
   0x9   : > { %p48_p2 = scmp.eq.s32.totalorder %s3822_s20, 0  ;;  %p100_p3 = scmp.eq.s32.totalorder %s2861_s21, 1 }
   0xa   : > { %s4534_s23 = smov (%p35_p0, %s33_s23), 0  ;;  %p105_p6 = scmp.ne.s32.totalorder %s3806_s16, %s3802_s15 }
   0xb   : > { %p49_p4 = por %p48_p2, %p47_p1  ;;  %p3895_p5 = por %p100_p3, %p47_p1 }
   0xc   : > { %s37_s26 = ssub.s32 %s3818_s19, %s4534_s23  ;;  %p106_p8 = scmp.eq.s32.totalorder %s4508_s22, 1 }
   0xd   : > { %p38_p7 = scmp.eq.s32.totalorder %s37_s26, 0  ;;  %p2864_p10 = scmp.ge.s32.totalorder %s3822_s20, 2 }
   0xe   : > { %p3908_p9 = por %p106_p8, %p105_p6 }
   0xf   : > { %s3906_s27 = scalar_select %p38_p7, %s3810_s17, %s40_s24  }
  0x10   : > { %181 = sbr.rel (%p2864_p10) target bundleno = 44 (0x2c), region = 20 }
  0x15   : > { %184 = sbr.rel (!%p49_p4) target bundleno = 44 (0x2c), region = 24  ;;  %s186_s29 = sand.u32 (%p49_p4), 1, %s3810_s17  }
  0x16   : > { %s3525_s30 = smul.u32 (%p49_p4), 72, %s3818_s19 }
  0x17   : > { %s3524_s5 = smul.u32 (%p49_p4), 288, %s186_s29 }
  0x18   : > { %s3920_s8 = scalar_lea.vmem (%p49_p4), %s4503_s0, %s3525_s30 }
  0x19   : > { %v208_v0 = vld [vmem:[%s3920_s8] sm:$0xff] (%p49_p4)   ;;  %v212_v1 = vld [vmem:[%s3920_s8 + $0x8] sm:$0xff] (%p49_p4)   ;;  %v216_v2 = vld [vmem:[%s3920_s8 + $0x10] sm:$0xff] (%p49_p4)   ;;  %s3925_s9 = scalar_lea.vmem (%p49_p4), [#allocation3], %s3524_s5 }
  0x1a   : > { %209 = vst [vmem:[%s3925_s9] sm:$0xff] %v208_v0   ;;  %213 = vst [vmem:[%s3925_s9 + $0x8] sm:$0xff] %v212_v1   ;;  %v220_v3 = vld [vmem:[%s3920_s8 + $0x18] sm:$0xff]   ;;  %v224_v4 = vld [vmem:[%s3920_s8 + $0x20] sm:$0xff]  }
  0x1b   : > { %217 = vst [vmem:[%s3925_s9 + $0x10] sm:$0xff] %v216_v2   ;;  %v228_v5 = vld [vmem:[%s3920_s8 + $0x28] sm:$0xff]   ;;  %221 = vst [vmem:[%s3925_s9 + $0x18] sm:$0xff] %v220_v3   ;;  %v232_v6 = vld [vmem:[%s3920_s8 + $0x30] sm:$0xff]  }
  0x1c   : > { %225 = vst [vmem:[%s3925_s9 + $0x20] sm:$0xff] %v224_v4   ;;  %229 = vst [vmem:[%s3925_s9 + $0x28] sm:$0xff] %v228_v5   ;;  %v236_v7 = vld [vmem:[%s3920_s8 + $0x38] sm:$0xff]   ;;  %v240_v8 = vld [vmem:[%s3920_s8 + $0x40] sm:$0xff]  }
  0x1d   : > { %233 = vst [vmem:[%s3925_s9 + $0x30] sm:$0xff] %v232_v6   ;;  %237 = vst [vmem:[%s3925_s9 + $0x38] sm:$0xff] %v236_v7   ;;  %v244_v9 = vld [vmem:[%s3920_s8 + $0x90] sm:$0xff]   ;;  %v248_v10 = vld [vmem:[%s3920_s8 + $0x98] sm:$0xff]  }
  0x1e   : > { %241 = vst [vmem:[%s3925_s9 + $0x40] sm:$0xff] %v240_v8   ;;  %v252_v11 = vld [vmem:[%s3920_s8 + $0xa0] sm:$0xff]   ;;  %245 = vst [vmem:[%s3925_s9 + $0x48] sm:$0xff] %v244_v9   ;;  %v256_v12 = vld [vmem:[%s3920_s8 + $0xa8] sm:$0xff]  }
  0x1f   : > { %249 = vst [vmem:[%s3925_s9 + $0x50] sm:$0xff] %v248_v10   ;;  %253 = vst [vmem:[%s3925_s9 + $0x58] sm:$0xff] %v252_v11   ;;  %v260_v13 = vld [vmem:[%s3920_s8 + $0xb0] sm:$0xff]   ;;  %v264_v14 = vld [vmem:[%s3920_s8 + $0xb8] sm:$0xff]  }
  0x20   : > { %257 = vst [vmem:[%s3925_s9 + $0x60] sm:$0xff] %v256_v12   ;;  %261 = vst [vmem:[%s3925_s9 + $0x68] sm:$0xff] %v260_v13   ;;  %v268_v15 = vld [vmem:[%s3920_s8 + $0xc0] sm:$0xff]   ;;  %v272_v16 = vld [vmem:[%s3920_s8 + $0xc8] sm:$0xff]  }
  0x21   : > { %265 = vst [vmem:[%s3925_s9 + $0x70] sm:$0xff] %v264_v14   ;;  %v276_v17 = vld [vmem:[%s3920_s8 + $0xd0] sm:$0xff]   ;;  %269 = vst [vmem:[%s3925_s9 + $0x78] sm:$0xff] %v268_v15   ;;  %v280_v18 = vld [vmem:[%s3920_s8 + $0x120] sm:$0xff]  }
  0x22   : > { %273 = vst [vmem:[%s3925_s9 + $0x80] sm:$0xff] %v272_v16   ;;  %277 = vst [vmem:[%s3925_s9 + $0x88] sm:$0xff] %v276_v17   ;;  %v284_v19 = vld [vmem:[%s3920_s8 + $0x128] sm:$0xff]   ;;  %v288_v20 = vld [vmem:[%s3920_s8 + $0x130] sm:$0xff]  }
  0x23   : > { %281 = vst [vmem:[%s3925_s9 + $0x90] sm:$0xff] %v280_v18   ;;  %285 = vst [vmem:[%s3925_s9 + $0x98] sm:$0xff] %v284_v19   ;;  %v292_v21 = vld [vmem:[%s3920_s8 + $0x138] sm:$0xff]   ;;  %v296_v22 = vld [vmem:[%s3920_s8 + $0x140] sm:$0xff]  }
  0x24   : > { %289 = vst [vmem:[%s3925_s9 + $0xa0] sm:$0xff] %v288_v20   ;;  %v300_v23 = vld [vmem:[%s3920_s8 + $0x148] sm:$0xff]   ;;  %293 = vst [vmem:[%s3925_s9 + $0xa8] sm:$0xff] %v292_v21   ;;  %v304_v24 = vld [vmem:[%s3920_s8 + $0x150] sm:$0xff]  }
  0x25   : > { %297 = vst [vmem:[%s3925_s9 + $0xb0] sm:$0xff] %v296_v22   ;;  %301 = vst [vmem:[%s3925_s9 + $0xb8] sm:$0xff] %v300_v23   ;;  %v308_v25 = vld [vmem:[%s3920_s8 + $0x158] sm:$0xff]   ;;  %v312_v26 = vld [vmem:[%s3920_s8 + $0x160] sm:$0xff]  }
  0x26   : > { %305 = vst [vmem:[%s3925_s9 + $0xc0] sm:$0xff] %v304_v24   ;;  %309 = vst [vmem:[%s3925_s9 + $0xc8] sm:$0xff] %v308_v25   ;;  %v316_v27 = vld [vmem:[%s3920_s8 + $0x1b0] sm:$0xff]   ;;  %v320_v28 = vld [vmem:[%s3920_s8 + $0x1b8] sm:$0xff]  }
  0x27   : > { %313 = vst [vmem:[%s3925_s9 + $0xd0] sm:$0xff] %v312_v26   ;;  %v324_v29 = vld [vmem:[%s3920_s8 + $0x1c0] sm:$0xff]   ;;  %317 = vst [vmem:[%s3925_s9 + $0xd8] sm:$0xff] %v316_v27   ;;  %v328_v30 = vld [vmem:[%s3920_s8 + $0x1c8] sm:$0xff]  }
  0x28   : > { %321 = vst [vmem:[%s3925_s9 + $0xe0] sm:$0xff] %v320_v28   ;;  %325 = vst [vmem:[%s3925_s9 + $0xe8] sm:$0xff] %v324_v29   ;;  %v332_v31 = vld [vmem:[%s3920_s8 + $0x1d0] sm:$0xff]   ;;  %v336_v32 = vld [vmem:[%s3920_s8 + $0x1d8] sm:$0xff]  }
  0x29   : > { %329 = vst [vmem:[%s3925_s9 + $0xf0] sm:$0xff] %v328_v30   ;;  %333 = vst [vmem:[%s3925_s9 + $0xf8] sm:$0xff] %v332_v31   ;;  %v340_v33 = vld [vmem:[%s3920_s8 + $0x1e0] sm:$0xff]   ;;  %v344_v34 = vld [vmem:[%s3920_s8 + $0x1e8] sm:$0xff]  }
  0x2a   : > { %337 = vst [vmem:[%s3925_s9 + $0x100] sm:$0xff] %v336_v32   ;;  %v348_v35 = vld [vmem:[%s3920_s8 + $0x1f0] sm:$0xff]   ;;  %341 = vst [vmem:[%s3925_s9 + $0x108] sm:$0xff] %v340_v33  }
  0x2b   : > { %345 = vst [vmem:[%s3925_s9 + $0x110] sm:$0xff] %v344_v34   ;;  %349 = vst [vmem:[%s3925_s9 + $0x118] sm:$0xff] %v348_v35  }
  0x2c PF: > { %p2866_p11 = scmp.ge.s32.totalorder %s3822_s20, 1  ;;  %p518_p12 = scmp.lt.s32.totalorder %s3822_s20, 3 }
  0x2e   : > { %p519_p13 = pnand %p2866_p11, %p518_p12 }
  0x30   : > { %522 = sbr.rel (%p519_p13) target bundleno = 485 (0x1e5), region = 65 }
  0x35   : > { %v3594_v36 = vld [vmem:[%s4504_s1 + $0x38] sm:$0xff]   ;;  %v3596_v38 = vld [vmem:[%s4504_s1 + $0x30] sm:$0xff]   ;;  %v3598_v40 = vld [vmem:[%s4504_s1 + $0x28] sm:$0xff]   ;;  %s4017_s8 = sand.u32 1, %s3806_s16   ;;  %vm962_vm0 = vsmask.f32 3328 }
  0x36   : > { %v3595_v37 = vld [vmem:[%s4504_s1 + $0x78] sm:$0xff]   ;;  %3292 = vmatprep.subr.bf16.mxu0 %v3594_v36  ;;  %v3597_v39 = vld [vmem:[%s4504_s1 + $0x70] sm:$0xff]   ;;  %v3599_v41 = vld [vmem:[%s4504_s1 + $0x68] sm:$0xff]   ;;  %s3526_s13 = smul.u32 288, %s4017_s8  ;;  %vm963_vm1 = vsmask.f32 7440 }
  0x37   : > { %3316 = vmatprep.subr.bf16.mxu1 %v3595_v37  ;;  %3293 = vmatpush3.bf16.msra.mxu0 %v3594_v36  ;;  %v3600_v42 = vld [vmem:[%s4504_s1 + $0x20] sm:$0xff]   ;;  %v3602_v44 = vld [vmem:[%s4504_s1 + $0x18] sm:$0xff]   ;;  %v3604_v46 = vld [vmem:[%s4504_s1 + $0x10] sm:$0xff]   ;;  %s2867_s7 = sshll.u32 %s4017_s8, 6  ;;  %s3183_s11 = sshll.u32 %s3814_s18, 10 }
  0x38   : > { %3317 = vmatpush3.bf16.msra.mxu1 %v3595_v37  ;;  %3294 = vmatprep.subr.bf16.mxu0 %v3596_v38  ;;  %v3601_v43 = vld [vmem:[%s4504_s1 + $0x60] sm:$0xff]   ;;  %v3603_v45 = vld [vmem:[%s4504_s1 + $0x58] sm:$0xff]   ;;  %v3605_v47 = vld [vmem:[%s4504_s1 + $0x50] sm:$0xff]   ;;  %s4038_s9 = scalar_lea.vmem [#allocation3], %s3526_s13  ;;  %s545_s10 = scalar_lea.vmem [#allocation4], %s2867_s7 }
  0x39   : > { %3318 = vmatprep.subr.bf16.mxu1 %v3597_v39  ;;  %v3610_v48 = vld [vmem:[%s4038_s9] ss:$8 sps:$4 sm:$0xff]   ;;  %v3612_v54 = vld [vmem:[%s4038_s9 + $0x10] ss:$8 sps:$4 sm:$0xff]   ;;  %v947_v5 = vld [vmem:[%s4038_s9 + $0x4] sm:$0x1]  ;;  %s4378_s24 = scalar_lea.hbm %s4505_s2, %s3183_s11 }
  0x3a   : > { %v3611_v49 = vld [vmem:[%s4038_s9 + $0x48] ss:$8 sps:$4 sm:$0xff]   ;;  %3308 = vmatprep.mubr.bf16.mxu0 %v3610_v48  ;;  %v3608_v52 = vld [vmem:[%s4504_s1] sm:$0xff]   ;;  %v3614_v55 = vld [vmem:[%s4504_s1 + $0xb8] sm:$0xff]   ;;  %v975_v11 = vshll.u32 %v947_v5, 16  ;;  %s2676_s12 = sshll.u32 %s545_s10, 4  ;;  %s4380_s12 = int_to_ptr.vmem [resolvable:$true] %s2676_s12 }
  0x3b   : > { %3295 = vmatpush3.bf16.msra.mxu0 %v3596_v38  ;;  %3332 = vmatprep.mubr.bf16.mxu1 %v3611_v49  ;;  %v3606_v50 = vld [vmem:[%s4504_s1 + $0x8] sm:$0xff]   ;;  %v3609_v53 = vld [vmem:[%s4504_s1 + $0x40] sm:$0xff]   ;;  %v3615_v56 = vld [vmem:[%s4504_s1 + $0xf8] sm:$0xff]   ;;  %s2653_s26 = scalar_lea.sflag [#allocation5], %s4017_s8  ;;  %s3690_s29 = scalar_lea.vmem %s4380_s12, 1024 }
  0x3c   : > { %3319 = vmatpush3.bf16.msra.mxu1 %v3597_v39  ;;  %3296 = vmatprep.subr.bf16.mxu0 %v3598_v40  ;;  %v3607_v51 = vld [vmem:[%s4504_s1 + $0x48] sm:$0xff]   ;;  %v3613_v57 = vld [vmem:[%s4038_s9 + $0x58] ss:$8 sps:$4 sm:$0xff]   ;;  %v3616_v58 = vld [vmem:[%s4504_s1 + $0xb0] sm:$0xff]   ;;  %v977_v21 = vrot.slane %v975_v11, 5  ;;  %p3691_p0 = scmp.ne.s32.totalorder %s4380_s12, %s3690_s29  ;;  %s3824_s30 = smov [#allocation4]  }
  0x3d   : > { %3320 = vmatprep.subr.bf16.mxu1 %v3599_v41  ;;  %v3617_v59 = vld [vmem:[%s4504_s1 + $0xf0] sm:$0xff]   ;;  %v3624_v60 = vld [vmem:[%s4038_s9 + $0x20] ss:$8 sps:$4 sm:$0xff]   ;;  %v949_v7 = vld [vmem:[%s4038_s9 + $0xc] sm:$0x1]  ;;  %s3694_s5 = sshll.u32 %s3824_s30, 4  ;;  %s3695_s5 = int_to_ptr.vmem [resolvable:$false] %s3694_s5 }
  0x3e   : > { %v3625_v61 = vld [vmem:[%s4038_s9 + $0x68] ss:$8 sps:$4 sm:$0xff]   ;;  %v3620_v0 = vld [vmem:[%s4504_s1 + $0xa0] sm:$0xff]   ;;  %v3622_v8 = vld [vmem:[%s4504_s1 + $0x98] sm:$0xff]   ;;  %v989_v16 = vshll.u32 %v949_v7, 16  ;;  %p3692_p1 = pnand %p3691_p0, %p3895_p5  ;;  %p3697_p3 = scmp.lt.s32.totalorder %s4380_s12, %s3695_s5 }
  0x3f   : > { %3297 = vmatpush3.bf16.msra.mxu0 %v3598_v40  ;;  %v3618_v62 = vld [vmem:[%s4504_s1 + $0xa8] sm:$0xff]   ;;  %v3626_v1 = vld [vmem:[%s4038_s9 + $0x30] ss:$8 sps:$4 sm:$0xff]   ;;  %v3621_v2 = vld [vmem:[%s4504_s1 + $0xe0] sm:$0xff]  }
  0x40   : > { %3321 = vmatpush3.bf16.msra.mxu1 %v3599_v41  ;;  %3298 = vmatprep.subr.bf16.mxu0 %v3600_v42  ;;  %v3619_v63 = vld [vmem:[%s4504_s1 + $0xe8] sm:$0xff]   ;;  %v3627_v3 = vld [vmem:[%s4038_s9 + $0x78] ss:$8 sps:$4 sm:$0xff]   ;;  %v950_v13 = vld [vmem:[%s4038_s9 + $0x10] sm:$0xf]  ;;  %v991_v25 = vrot.slane %v989_v16, 5  ;;  %p3693_p2 = pneg %p3692_p1 }
  0x41   : > { %3322 = vmatprep.subr.bf16.mxu1 %v3601_v43  ;;  %v946_v4 = vld [vmem:[%s4038_s9] sm:$0xf]  ;;  %v948_v6 = vld [vmem:[%s4038_s9 + $0x8] sm:$0xf]  ;;  %v3623_v14 = vld [vmem:[%s4504_s1 + $0xd8] sm:$0xff]   ;;  %v994_v26 = vshrl.u32 %v950_v13, 16 }
  0x42   : > { %v966_v9 = vshrl.u32 %v946_v4, 16  ;;  %v969_v10 = vshll.u32 %v946_v4, 16  ;;  %v980_v12 = vshrl.u32 %v948_v6, 16  ;;  %v983_v15 = vshll.u32 %v948_v6, 16  ;;  %v951_v17 = vld [vmem:[%s4038_s9 + $0x14] sm:$0x1]  ;;  %vm4103_vm2 = vmor %vm962_vm0, %vm963_vm1 }
  0x43   : > { %3299 = vmatpush3.bf16.msra.mxu0 %v3600_v42  ;;  %v952_v18 = vld [vmem:[%s4038_s9 + $0x18] sm:$0xf]  ;;  %v953_v23 = vld [vmem:[%s4038_s9 + $0x1c] sm:$0x1]  ;;  %v997_v27 = vshll.u32 %v950_v13, 16  ;;  %v1003_v29 = vshll.u32 %v951_v17, 16 }
  0x44   : > { %3323 = vmatpush3.bf16.msra.mxu1 %v3601_v43  ;;  %3300 = vmatprep.subr.bf16.mxu0 %v3602_v44  ;;  %v968_v19 = vrot.slane %v966_v9, 4  ;;  %v971_v20 = vrot.slane %v969_v10, 5  ;;  %v982_v22 = vrot.slane %v980_v12, 4  ;;  %v985_v24 = vrot.slane %v983_v15, 5  ;;  %v3628_v32 = vld [vmem:[%s4504_s1 + $0x90] sm:$0xff]   ;;  %v3630_v48 = vld [vmem:[%s4504_s1 + $0x88] sm:$0xff]  }
  0x45   : > { %3324 = vmatprep.subr.bf16.mxu1 %v3603_v45  ;;  %v1008_v30 = vshrl.u32 %v952_v18, 16  ;;  %v1011_v31 = vshll.u32 %v952_v18, 16  ;;  %v996_v35 = vrot.slane %v994_v26, 4  ;;  %v999_v36 = vrot.slane %v997_v27, 5  ;;  %v3634_v38 = vld [vmem:[%s4038_s9 + $0x90] ss:$8 sps:$4 sm:$0xff]  }
  0x46   : > { %v972_v28 = vor.u32 %v971_v20, %v968_v19  ;;  %v986_v34 = vor.u32 %v985_v24, %v982_v22  ;;  %v1017_v37 = vshll.u32 %v953_v23, 16  ;;  %v3629_v39 = vld [vmem:[%s4504_s1 + $0xd0] sm:$0xff]   ;;  %v960_v13 = vld [vmem:[%s4038_s9 + $0x38] sm:$0xf]  ;;  %v961_v17 = vld [vmem:[%s4038_s9 + $0x3c] sm:$0x1] }
  0x47   : > { %3301 = vmatpush3.bf16.msra.mxu0 %v3602_v44  ;;  %v1010_v41 = vrot.slane %v1008_v30, 4  ;;  %v1013_v42 = vrot.slane %v1011_v31, 5  ;;  %v1000_v44 = vor.u32 %v999_v36, %v996_v35  ;;  %v958_v4 = vld [vmem:[%s4038_s9 + $0x30] sm:$0xf]  ;;  %v1064_v22 = vshrl.u32 %v960_v13, 16  ;;  %v3635_v24 = vld [vmem:[%s4504_s1 + $0x138] sm:$0xff]  }
  0x48   : > { %3325 = vmatpush3.bf16.msra.mxu1 %v3603_v45  ;;  %3302 = vmatprep.subr.bf16.mxu0 %v3604_v46  ;;  %v973_v40 = vrot.slane %v972_v28, 4  ;;  %v987_v43 = vrot.slane %v986_v34, 4  ;;  %v4111_v45 = vrot.slane %v1003_v29, 5  ;;  %v1050_v9 = vshrl.u32 %v958_v4, 16  ;;  %v3636_v27 = vld [vmem:[%s4504_s1 + $0x178] sm:$0xff]  }
  0x49   : > { %3326 = vmatprep.subr.bf16.mxu1 %v3605_v47  ;;  %v1067_v23 = vshll.u32 %v960_v13, 16  ;;  %v1073_v26 = vshll.u32 %v961_v17, 16  ;;  %v3637_v28 = vld [vmem:[%s4038_s9 + $0xa0] ss:$8 sps:$4 sm:$0xff]   ;;  %v1066_v31 = vrot.slane %v1064_v22, 4 }
  0x4a   : > { %v992_v49 = vsel %vm4103_vm2, %v987_v43, %v991_v25  ;;  %v1052_v18 = vrot.slane %v1050_v9, 4  ;;  %v3639_v43 = vld [vmem:[%s4504_s1 + $0x170] sm:$0xff]   ;;  %v3021_v13 = vld [vmem:[%s4038_s9 + $0xa4] sm:$0x1] }
  0x4b   : > { %3303 = vmatpush3.bf16.msra.mxu0 %v3604_v46  ;;  %v978_v46 = vsel %vm4103_vm2, %v973_v40, %v977_v21 }
  0x4c   : > { %3327 = vmatpush3.bf16.msra.mxu1 %v3605_v47  ;;  %3304 = vmatprep.subr.bf16.mxu0 %v3606_v50  ;;  %v1014_v47 = vor.u32 %v1013_v42, %v1010_v41  ;;  %v1075_v41 = vrot.slane %v1073_v26, 5  ;;  %v3642_v42 = vld [vmem:[%s4038_s9 + $0xb0] ss:$8 sps:$4 sm:$0xff]  }
  0x4d   : > { %3328 = vmatprep.subr.bf16.mxu1 %v3607_v51 }
  0x4f   : > { %3305 = vmatpush3.bf16.msra.mxu0 %v3606_v50  ;;  %v1001_v50 = vrot.slane %v1000_v44, 4 }
  0x50   : > { %3329 = vmatpush3.bf16.msra.mxu1 %v3607_v51  ;;  %3306 = vmatprep.subr.bf16.mxu0 %v3608_v52  ;;  %v1019_v51 = vrot.slane %v1017_v37, 5  ;;  %v3638_v37 = vld [vmem:[%s4504_s1 + $0x130] sm:$0xff]  }
  0x51   : > { %3330 = vmatprep.subr.bf16.mxu1 %v3609_v53 }
  0x53   : > { %3307 = vmatpush3.bf16.msra.mxu0 %v3608_v52  ;;  %v3631_v52 = vld [vmem:[%s4504_s1 + $0xc8] sm:$0xff]  }
  0x54   : > { %3331 = vmatpush3.bf16.msra.mxu1 %v3609_v53  ;;  %3340 = vmatprep.subr.bf16.mxu0 %v3614_v55  ;;  %v2932_v53 = vcombine.low %v978_v46, %v992_v49  ;;  %v3640_v46 = vld [vmem:[%s4504_s1 + $0x128] sm:$0xff]  }
  0x55   : > { %3364 = vmatprep.subr.bf16.mxu1 %v3615_v56  ;;  %v3641_v49 = vld [vmem:[%s4504_s1 + $0x168] sm:$0xff]  }
  0x56   : > { %3309 = vmatmul.mubr.bf16.vlgmr.msra.gmra.mxu0 %v3612_v54  ;;  %v1015_v54 = vrot.slane %v1014_v47, 4 }
  0x57   : > { %3333 = vmatmul.mubr.bf16.vlgmr.msra.gmra.mxu1 %v3613_v57  ;;  %3341 = vmatpush3.bf16.msra.mxu0 %v3614_v55  ;;  %v954_v55 = vld [vmem:[%s4038_s9 + $0x20] sm:$0xf] }
  0x58   : > { %3365 = vmatpush3.bf16.msra.mxu1 %v3615_v56  ;;  %3342 = vmatprep.subr.bf16.mxu0 %v3616_v58  ;;  %v955_v56 = vld [vmem:[%s4038_s9 + $0x24] sm:$0x1] }
  0x59   : > { %3366 = vmatprep.subr.bf16.mxu1 %v3617_v59  ;;  %3312 = vmatprep.mubr.bf16.mxu0 %v3624_v60  ;;  %v3632_v57 = vld [vmem:[%s4504_s1 + $0x80] sm:$0xff]   ;;  %v957_v60 = vld [vmem:[%s4038_s9 + $0x2c] sm:$0x1] }
  0x5a   : > { %3336 = vmatprep.mubr.bf16.mxu1 %v3625_v61  ;;  %v1022_v61 = vshrl.u32 %v954_v55, 16  ;;  %v1045_v7 = vshll.u32 %v957_v60, 16  ;;  %v3019_v60 = vld [vmem:[%s4038_s9 + $0x9c] sm:$0x1] }
  0x5b   : > { %3343 = vmatpush3.bf16.msra.mxu0 %v3616_v58  ;;  %v1006_v58 = vsel %vm4103_vm2, %v1001_v50, %v4111_v45 }
  0x5c   : > { %3367 = vmatpush3.bf16.msra.mxu1 %v3617_v59  ;;  %3344 = vmatprep.subr.bf16.mxu0 %v3618_v62  ;;  %v956_v59 = vld [vmem:[%s4038_s9 + $0x28] sm:$0xf]  ;;  %v1024_v5 = vrot.slane %v1022_v61, 4  ;;  %v1047_v16 = vrot.slane %v1045_v7, 5 }
  0x5d   : > { %3368 = vmatprep.subr.bf16.mxu1 %v3619_v63 }
  0x5e   : > { %3313 = vmatmul.mubr.bf16.gmra.mxu0 %v3626_v1  ;;  %v1031_v1 = vshll.u32 %v955_v56, 16  ;;  %v3647_v56 = vld [vmem:[%s4504_s1 + $0x158] sm:$0xff]  }
  0x5f   : > { %3345 = vmatpush3.bf16.msra.mxu0 %v3618_v62  ;;  %3337 = vmatmul.mubr.bf16.gmra.mxu1 %v3627_v3  ;;  %v1025_v62 = vshll.u32 %v954_v55, 16  ;;  %v1039_v3 = vshll.u32 %v956_v59, 16  ;;  %v3654_v55 = vld [vmem:[%s4038_s9 + $0xd8] ss:$8 sps:$4 sm:$0xff]  }
  0x60   : > { %3369 = vmatpush3.bf16.msra.mxu1 %v3619_v63  ;;  %3346 = vmatprep.subr.bf16.mxu0 %v3620_v0  ;;  %v3633_v63 = vld [vmem:[%s4504_s1 + $0xc0] sm:$0xff]   ;;  %v1033_v10 = vrot.slane %v1031_v1, 5 }
  0x61   : > { %3370 = vmatprep.subr.bf16.mxu1 %v3621_v2  ;;  %3380 = vmatprep.mubr.bf16.mxu1 %v3634_v38  ;;  %v1027_v6 = vrot.slane %v1025_v62, 5  ;;  %v1041_v12 = vrot.slane %v1039_v3, 5  ;;  %v3648_v3 = vld [vmem:[%s4504_s1 + $0x110] sm:$0xff]  }
  0x62   : > { %3356 = vmatprep.mubr.bf16.mxu0 %v2932_v53  ;;  %v3645_v53 = vld [vmem:[%s4504_s1 + $0x160] sm:$0xff]  }
  0x63   : > { %3347 = vmatpush3.bf16.msra.mxu0 %v3620_v0  ;;  %v1020_v0 = vsel %vm4103_vm2, %v1015_v54, %v1019_v51  ;;  %v1028_v15 = vor.u32 %v1027_v6, %v1024_v5  ;;  %v3643_v51 = vld [vmem:[%s4038_s9 + $0xc0] ss:$8 sps:$4 sm:$0xff]   ;;  %v3646_v54 = vld [vmem:[%s4504_s1 + $0x118] sm:$0xff]   ;;  %v3649_v6 = vld [vmem:[%s4504_s1 + $0x150] sm:$0xff]  }
  0x64   : > { %3371 = vmatpush3.bf16.msra.mxu1 %v3621_v2  ;;  %3348 = vmatprep.subr.bf16.mxu0 %v3622_v8  ;;  %v1036_v2 = vshrl.u32 %v956_v59, 16  ;;  %v2933_v34 = vcombine.low %v1006_v58, %v1020_v0  ;;  %v3017_v58 = vld [vmem:[%s4038_s9 + $0x94] sm:$0x1]  ;;  %v3018_v59 = vld [vmem:[%s4038_s9 + $0x98] sm:$0xf] }
  0x65   : > { %3372 = vmatprep.subr.bf16.mxu1 %v3623_v14  ;;  %v1029_v25 = vrot.slane %v1028_v15, 4  ;;  %v1656_v0 = vshrl.u32 %v3018_v59, 16  ;;  %v1659_v1 = vshll.u32 %v3018_v59, 16  ;;  %v3022_v15 = vld [vmem:[%s4038_s9 + $0xa8] sm:$0xf] }
  0x66   : > { %v1038_v11 = vrot.slane %v1036_v2, 4  ;;  %v1665_v2 = vshll.u32 %v3019_v60, 16  ;;  %v1687_v22 = vshll.u32 %v3022_v15, 16  ;;  %v3029_v60 = vld [vmem:[%s4038_s9 + $0xc4] sm:$0x1] }
  0x67   : > { %3349 = vmatpush3.bf16.msra.mxu0 %v3622_v8  ;;  %v959_v8 = vld [vmem:[%s4038_s9 + $0x34] sm:$0x1]  ;;  %v1034_v35 = vsel %vm4103_vm2, %v1029_v25, %v1033_v10  ;;  %v1661_v9 = vrot.slane %v1659_v1, 5  ;;  %v3030_v1 = vld [vmem:[%s4038_s9 + $0xc8] sm:$0xf] }
  0x68   : > { %3373 = vmatpush3.bf16.msra.mxu1 %v3623_v14  ;;  %3350 = vmatprep.subr.bf16.mxu0 %v3628_v32  ;;  %v1053_v14 = vshll.u32 %v958_v4, 16  ;;  %v1059_v19 = vshll.u32 %v959_v8, 16  ;;  %v1042_v20 = vor.u32 %v1041_v12, %v1038_v11  ;;  %v1658_v8 = vrot.slane %v1656_v0, 4  ;;  %v3020_v12 = vld [vmem:[%s4038_s9 + $0xa0] sm:$0xf] }
  0x69   : > { %3374 = vmatprep.subr.bf16.mxu1 %v3629_v39  ;;  %v1667_v10 = vrot.slane %v1665_v2, 5  ;;  %v1670_v17 = vshrl.u32 %v3020_v12, 16 }
  0x6a   : > { %v1055_v21 = vrot.slane %v1053_v14, 5  ;;  %v1043_v29 = vrot.slane %v1042_v20, 4  ;;  %v1061_v36 = vrot.slane %v1059_v19, 5  ;;  %v1662_v14 = vor.u32 %v1661_v9, %v1658_v8  ;;  %v3659_v9 = vld [vmem:[%s4504_s1 + $0x1f0] sm:$0xff]  }
  0x6b   : > { %3351 = vmatpush3.bf16.msra.mxu0 %v3628_v32  ;;  %v1069_v32 = vrot.slane %v1067_v23, 5  ;;  %v1679_v20 = vshll.u32 %v3021_v13, 16  ;;  %v1740_v13 = vshrl.u32 %v3030_v1, 16 }
  0x6c   : > { %3375 = vmatpush3.bf16.msra.mxu1 %v3629_v39  ;;  %3352 = vmatprep.subr.bf16.mxu0 %v3630_v48  ;;  %v1056_v30 = vor.u32 %v1055_v21, %v1052_v18  ;;  %v1048_v38 = vsel %vm4103_vm2, %v1043_v29, %v1047_v16  ;;  %v3023_v16 = vld [vmem:[%s4038_s9 + $0xac] sm:$0x1]  ;;  %v1673_v18 = vshll.u32 %v3020_v12, 16  ;;  %v1684_v21 = vshrl.u32 %v3022_v15, 16 }
  0x6d   : > { %3376 = vmatprep.subr.bf16.mxu1 %v3631_v52  ;;  %v1070_v40 = vor.u32 %v1069_v32, %v1066_v31  ;;  %v2934_v44 = vcombine.low %v1034_v35, %v1048_v38  ;;  %v1663_v23 = vrot.slane %v1662_v14, 4  ;;  %v1693_v26 = vshll.u32 %v3023_v16, 16  ;;  %v3651_v31 = vld [vmem:[%s4504_s1 + $0x148] sm:$0xff]  }
  0x6e   : > { %v1057_v39 = vrot.slane %v1056_v30, 4  ;;  %v1675_v25 = vrot.slane %v1673_v18, 5  ;;  %v1686_v29 = vrot.slane %v1684_v21, 4  ;;  %v1689_v30 = vrot.slane %v1687_v22, 5  ;;  %v3662_v21 = vld [vmem:[%s4504_s1 + $0x1a8] sm:$0xff]  }
  0x6f   : > { %3353 = vmatpush3.bf16.msra.mxu0 %v3630_v48  ;;  %v1071_v45 = vrot.slane %v1070_v40, 4  ;;  %v1668_v32 = vsel %vm4103_vm2, %v1663_v23, %v1667_v10  ;;  %v1681_v35 = vrot.slane %v1679_v20, 5  ;;  %v1695_v38 = vrot.slane %v1693_v26, 5 }
  0x70   : > { %3377 = vmatpush3.bf16.msra.mxu1 %v3631_v52  ;;  %3354 = vmatprep.subr.bf16.mxu0 %v3632_v57  ;;  %v1062_v47 = vsel %vm4103_vm2, %v1057_v39, %v1061_v36  ;;  %v3644_v52 = vld [vmem:[%s4504_s1 + $0x120] sm:$0xff]   ;;  %v1735_v12 = vshll.u32 %v3029_v60, 16  ;;  %v1743_v15 = vshll.u32 %v3030_v1, 16  ;;  %v1742_v20 = vrot.slane %v1740_v13, 4  ;;  %v3140_v60 = vld [vmem:[%s4038_s9 + $0x28] sm:$0xf] }
  0x71   : > { %3378 = vmatprep.subr.bf16.mxu1 %v3633_v63  ;;  %v1076_v48 = vsel %vm4103_vm2, %v1071_v45, %v1075_v41  ;;  %v3652_v39 = vld [vmem:[%s4504_s1 + $0x100] sm:$0xff]   ;;  %v3656_v45 = vld [vmem:[%s4504_s1 + $0x1b8] sm:$0xff]   ;;  %v3679_v13 = vld [vmem:[%s4504_s1 + $0x230] sm:$0xff]  }
  0x72   : > { %v2935_v50 = vcombine.low %v1062_v47, %v1076_v48  ;;  %v3653_v41 = vld [vmem:[%s4504_s1 + $0x140] sm:$0xff]   ;;  %v3025_v47 = vld [vmem:[%s4038_s9 + $0xb4] sm:$0x1]  ;;  %v3026_v48 = vld [vmem:[%s4038_s9 + $0xb8] sm:$0xf]  ;;  %v1737_v23 = vrot.slane %v1735_v12, 5 }
  0x73   : > { %3355 = vmatpush3.bf16.msra.mxu0 %v3632_v57  ;;  %v3016_v57 = vld [vmem:[%s4038_s9 + $0x90] sm:$0xf] }
  0x74   : > { %3379 = vmatpush3.bf16.msra.mxu1 %v3633_v63  ;;  %3388 = vmatprep.subr.bf16.mxu0 %v3635_v24  ;;  %v1642_v61 = vshrl.u32 %v3016_v57, 16  ;;  %v1645_v62 = vshll.u32 %v3016_v57, 16  ;;  %v1651_v63 = vshll.u32 %v3017_v58, 16  ;;  %v1712_v57 = vshrl.u32 %v3026_v48, 16 }
  0x75   : > { %3412 = vmatprep.subr.bf16.mxu1 %v3636_v27  ;;  %v1715_v58 = vshll.u32 %v3026_v48, 16  ;;  %v3672_v48 = vld [vmem:[%s4504_s1 + $0x180] sm:$0xff]  }
  0x76   : > { %3357 = vmatmul.mubr.bf16.vlgmr.msra.gmra.mxu0 %v2933_v34  ;;  %v1644_v4 = vrot.slane %v1642_v61, 4  ;;  %v1647_v5 = vrot.slane %v1645_v62, 5  ;;  %v1653_v7 = vrot.slane %v1651_v63, 5 }
  0x77   : > { %3381 = vmatmul.mubr.bf16.vlgmr.msra.gmra.mxu1 %v3637_v28  ;;  %3389 = vmatpush3.bf16.msra.mxu0 %v3635_v24  ;;  %v1672_v24 = vrot.slane %v1670_v17, 4  ;;  %v3660_v17 = vld [vmem:[%s4038_s9 + $0xf8] ss:$8 sps:$4 sm:$0xff]  }
  0x78   : > { %3413 = vmatpush3.bf16.msra.mxu1 %v3636_v27  ;;  %3390 = vmatprep.subr.bf16.mxu0 %v3638_v37  ;;  %v1648_v11 = vor.u32 %v1647_v5, %v1644_v4  ;;  %v3650_v27 = vld [vmem:[%s4504_s1 + $0x108] sm:$0xff]   ;;  %v1714_v4 = vrot.slane %v1712_v57, 4  ;;  %v1717_v5 = vrot.slane %v1715_v58, 5  ;;  %v3675_v57 = vld [vmem:[%s4038_s9 + $0x18] ss:$8 sps:$4 sm:$0xff]  }
  0x79   : > { %3414 = vmatprep.subr.bf16.mxu1 %v3639_v43  ;;  %3360 = vmatprep.mubr.bf16.mxu0 %v2934_v44  ;;  %v1676_v34 = vor.u32 %v1675_v25, %v1672_v24  ;;  %v3024_v44 = vld [vmem:[%s4038_s9 + $0xb0] sm:$0xf]  ;;  %v1745_v24 = vrot.slane %v1743_v15, 5  ;;  %v3677_v58 = vld [vmem:[%s4504_s1 + $0x238] sm:$0xff]  }
  0x7a   : > { %3384 = vmatprep.mubr.bf16.mxu1 %v3642_v42  ;;  %v1649_v19 = vrot.slane %v1648_v11, 4  ;;  %v1718_v14 = vor.u32 %v1717_v5, %v1714_v4  ;;  %v3143_v5 = vld [vmem:[%s4038_s9 + $0x34] sm:$0x1] }
  0x7b   : > { %3391 = vmatpush3.bf16.msra.mxu0 %v3638_v37  ;;  %v1690_v37 = vor.u32 %v1689_v30, %v1686_v29  ;;  %v1677_v40 = vrot.slane %v1676_v34, 4  ;;  %v1746_v30 = vor.u32 %v1745_v24, %v1742_v20 }
  0x7c   : > { %3415 = vmatpush3.bf16.msra.mxu1 %v3639_v43  ;;  %3392 = vmatprep.subr.bf16.mxu0 %v3640_v46  ;;  %v1654_v28 = vsel %vm4103_vm2, %v1649_v19, %v1653_v7  ;;  %v3031_v7 = vld [vmem:[%s4038_s9 + $0xcc] sm:$0x1]  ;;  %v1719_v22 = vrot.slane %v1718_v14, 4 }
  0x7d   : > { %3416 = vmatprep.subr.bf16.mxu1 %v3641_v49  ;;  %v3048_v36 = vcombine.low %v1654_v28, %v1668_v32  ;;  %v1691_v42 = vrot.slane %v1690_v37, 4  ;;  %v1682_v43 = vsel %vm4103_vm2, %v1677_v40, %v1681_v35  ;;  %v1749_v16 = vshll.u32 %v3031_v7, 16  ;;  %v3661_v28 = vld [vmem:[%s4038_s9 + $0x108] ss:$8 sps:$4 sm:$0xff]   ;;  %v3664_v37 = vld [vmem:[%s4504_s1 + $0x1a0] sm:$0xff]  }
  0x7e   : > { %3361 = vmatmul.mubr.bf16.gmra.mxu0 %v2935_v50  ;;  %v3657_v50 = vld [vmem:[%s4504_s1 + $0x1f8] sm:$0xff]   ;;  %v1747_v35 = vrot.slane %v1746_v30, 4  ;;  %v3674_v40 = vld [vmem:[%s4038_s9 + $0x8] ss:$8 sps:$4 sm:$0xff]   ;;  %v2378_v7 = vshll.u32 %v3140_v60, 16 }
  0x7f   : > { %3393 = vmatpush3.bf16.msra.mxu0 %v3640_v46  ;;  %3385 = vmatmul.mubr.bf16.gmra.mxu1 %v3643_v51  ;;  %v1696_v46 = vsel %vm4103_vm2, %v1691_v42, %v1695_v38  ;;  %v3676_v42 = vld [vmem:[%s4038_s9 + $0x50] ss:$8 sps:$4 sm:$0xff]   ;;  %v3682_v30 = vld [vmem:[%s4504_s1 + $0x228] sm:$0xff]  }
  0x80   : > { %3417 = vmatpush3.bf16.msra.mxu1 %v3641_v49  ;;  %3394 = vmatprep.subr.bf16.mxu0 %v3644_v52  ;;  %v3027_v49 = vld [vmem:[%s4038_s9 + $0xbc] sm:$0x1]  ;;  %v3049_v51 = vcombine.low %v1682_v43, %v1696_v46  ;;  %v3670_v46 = vld [vmem:[%s4504_s1 + $0x188] sm:$0xff]  }
  0x81   : > { %3418 = vmatprep.subr.bf16.mxu1 %v3645_v53  ;;  %3404 = vmatprep.mubr.bf16.mxu0 %v3654_v55  ;;  %v3028_v55 = vld [vmem:[%s4038_s9 + $0xc0] sm:$0xf]  ;;  %v1721_v59 = vshll.u32 %v3027_v49, 16  ;;  %v3667_v43 = vld [vmem:[%s4504_s1 + $0x1d8] sm:$0xff]  }
  0x82   : > { %3428 = vmatprep.mubr.bf16.mxu1 %v3048_v36  ;;  %v1726_v61 = vshrl.u32 %v3028_v55, 16  ;;  %v1729_v2 = vshll.u32 %v3028_v55, 16  ;;  %v3673_v49 = vld [vmem:[%s4504_s1 + $0x1c0] sm:$0xff]  }
  0x83   : > { %3395 = vmatpush3.bf16.msra.mxu0 %v3644_v52  ;;  %v1698_v52 = vshrl.u32 %v3024_v44, 16 }
  0x84   : > { %3419 = vmatpush3.bf16.msra.mxu1 %v3645_v53  ;;  %3396 = vmatprep.subr.bf16.mxu0 %v3646_v54  ;;  %v1701_v53 = vshll.u32 %v3024_v44, 16  ;;  %v1728_v8 = vrot.slane %v1726_v61, 4  ;;  %v1731_v11 = vrot.slane %v1729_v2, 5  ;;  %v3668_v44 = vld [vmem:[%s4504_s1 + $0x190] sm:$0xff]   ;;  %v3141_v61 = vld [vmem:[%s4038_s9 + $0x2c] sm:$0x1] }
  0x85   : > { %3420 = vmatprep.subr.bf16.mxu1 %v3647_v56  ;;  %v1700_v62 = vrot.slane %v1698_v52, 4  ;;  %v3134_v52 = vld [vmem:[%s4038_s9 + $0x10] sm:$0xf] }
  0x86   : > { %v1703_v63 = vrot.slane %v1701_v53, 5  ;;  %v1732_v19 = vor.u32 %v1731_v11, %v1728_v8  ;;  %v3135_v53 = vld [vmem:[%s4038_s9 + $0x14] sm:$0x1]  ;;  %v3142_v2 = vld [vmem:[%s4038_s9 + $0x30] sm:$0xf] }
  0x87   : > { %3397 = vmatpush3.bf16.msra.mxu0 %v3646_v54  ;;  %v1707_v54 = vshll.u32 %v3025_v47, 16  ;;  %v3671_v47 = vld [vmem:[%s4504_s1 + $0x1c8] sm:$0xff]   ;;  %v2342_v4 = vshll.u32 %v3135_v53, 16  ;;  %v2389_v11 = vshrl.u32 %v3142_v2, 16  ;;  %v2392_v12 = vshll.u32 %v3142_v2, 16 }
  0x88   : > { %3421 = vmatpush3.bf16.msra.mxu1 %v3647_v56  ;;  %3398 = vmatprep.subr.bf16.mxu0 %v3648_v3  ;;  %v3655_v56 = vld [vmem:[%s4038_s9 + $0xe8] ss:$8 sps:$4 sm:$0xff]   ;;  %v1704_v10 = vor.u32 %v1703_v63, %v1700_v62  ;;  %v1733_v26 = vrot.slane %v1732_v19, 4 }
  0x89   : > { %3422 = vmatprep.subr.bf16.mxu1 %v3649_v6  ;;  %v1709_v0 = vrot.slane %v1707_v54, 5  ;;  %v3678_v8 = vld [vmem:[%s4038_s9 + $0x60] ss:$8 sps:$4 sm:$0xff]   ;;  %v2391_v20 = vrot.slane %v2389_v11, 4 }
  0x8a   : > { %v1705_v18 = vrot.slane %v1704_v10, 4  ;;  %v1738_v34 = vsel %vm4103_vm2, %v1733_v26, %v1737_v23  ;;  %v2384_v10 = vshll.u32 %v3141_v61, 16 }
  0x8b   : > { %3399 = vmatpush3.bf16.msra.mxu0 %v3648_v3  ;;  %v3658_v3 = vld [vmem:[%s4504_s1 + $0x1b0] sm:$0xff]  }
  0x8c   : > { %3423 = vmatpush3.bf16.msra.mxu1 %v3649_v6  ;;  %3400 = vmatprep.subr.bf16.mxu0 %v3650_v27  ;;  %v1723_v6 = vrot.slane %v1721_v59, 5  ;;  %v1710_v25 = vsel %vm4103_vm2, %v1705_v18, %v1709_v0  ;;  %v2336_v59 = vshll.u32 %v3134_v52, 16  ;;  %v3680_v18 = vld [vmem:[%s4038_s9 + $0x28] ss:$8 sps:$4 sm:$0xff]  }
  0x8d   : > { %3424 = vmatprep.subr.bf16.mxu1 %v3651_v31 }
  0x8e   : > { %v1724_v29 = vsel %vm4103_vm2, %v1719_v22, %v1723_v6  ;;  %v2375_v6 = vshrl.u32 %v3140_v60, 16  ;;  %v3683_v22 = vld [vmem:[%s4038_s9 + $0x70] ss:$8 sps:$4 sm:$0xff]  }
  0x8f   : > { %3401 = vmatpush3.bf16.msra.mxu0 %v3650_v27  ;;  %v1751_v27 = vrot.slane %v1749_v16, 5  ;;  %v3050_v32 = vcombine.low %v1710_v25, %v1724_v29  ;;  %v2380_v16 = vrot.slane %v2378_v7, 5  ;;  %v2344_v25 = vrot.slane %v2342_v4, 5  ;;  %v3147_v4 = vld [vmem:[%s4038_s9 + $0x44] sm:$0x1] }
  0x90   : > { %3425 = vmatpush3.bf16.msra.mxu1 %v3651_v31  ;;  %3402 = vmatprep.subr.bf16.mxu0 %v3652_v39  ;;  %v3663_v31 = vld [vmem:[%s4504_s1 + $0x1e8] sm:$0xff]   ;;  %v2377_v15 = vrot.slane %v2375_v6, 4 }
  0x91   : > { %3426 = vmatprep.subr.bf16.mxu1 %v3653_v41  ;;  %v1752_v36 = vsel %vm4103_vm2, %v1747_v35, %v1751_v27  ;;  %v2386_v27 = vrot.slane %v2384_v10, 5 }
  0x92   : > { %v3051_v38 = vcombine.low %v1738_v34, %v1752_v36  ;;  %v2381_v26 = vor.u32 %v2380_v16, %v2377_v15  ;;  %v3681_v34 = vld [vmem:[%s4038_s9 + $0x38] ss:$8 sps:$4 sm:$0xff]  }
  0x93   : > { %3403 = vmatpush3.bf16.msra.mxu0 %v3652_v39  ;;  %v3665_v39 = vld [vmem:[%s4504_s1 + $0x1e0] sm:$0xff]  }
  0x94   : > { %3427 = vmatpush3.bf16.msra.mxu1 %v3653_v41  ;;  %3436 = vmatprep.subr.bf16.mxu0 %v3656_v45  ;;  %v3666_v41 = vld [vmem:[%s4504_s1 + $0x198] sm:$0xff]  }
  0x95   : > { %3460 = vmatprep.subr.bf16.mxu1 %v3657_v50 }
  0x96   : > { %3405 = vmatmul.mubr.bf16.vlgmr.msra.gmra.mxu0 %v3655_v56  ;;  %v2333_v56 = vshrl.u32 %v3134_v52, 16 }
  0x97   : > { %3429 = vmatmul.mubr.bf16.vlgmr.msra.gmra.mxu1 %v3049_v51  ;;  %3437 = vmatpush3.bf16.msra.mxu0 %v3656_v45  ;;  %v3669_v45 = vld [vmem:[%s4504_s1 + $0x1d0] sm:$0xff]   ;;  %v3133_v51 = vld [vmem:[%s4038_s9 + $0xc] sm:$0x1] }
  0x98   : > { %3461 = vmatpush3.bf16.msra.mxu1 %v3657_v50  ;;  %3438 = vmatprep.subr.bf16.mxu0 %v3658_v3  ;;  %v3132_v50 = vld [vmem:[%s4038_s9 + $0x8] sm:$0xf]  ;;  %v2328_v0 = vshll.u32 %v3133_v51, 16  ;;  %v2335_v1 = vrot.slane %v2333_v56, 4  ;;  %v3686_v51 = vld [vmem:[%s4504_s1 + $0x218] sm:$0xff]   ;;  %v3687_v56 = vld [vmem:[%s4504_s1 + $0x210] sm:$0xff]  }
  0x99   : > { %3462 = vmatprep.subr.bf16.mxu1 %v3659_v9  ;;  %3408 = vmatprep.mubr.bf16.mxu0 %v3660_v17  ;;  %v2319_v54 = vshrl.u32 %v3132_v50, 16  ;;  %v2322_v55 = vshll.u32 %v3132_v50, 16  ;;  %v2398_v17 = vshll.u32 %v3143_v5, 16 }
  0x9a   : > { %3432 = vmatprep.mubr.bf16.mxu1 %v3050_v32  ;;  %v2330_v19 = vrot.slane %v2328_v0, 5 }
  0x9b   : > { %3439 = vmatpush3.bf16.msra.mxu0 %v3658_v3  ;;  %v2321_v62 = vrot.slane %v2319_v54, 4  ;;  %v2324_v63 = vrot.slane %v2322_v55, 5  ;;  %v2338_v3 = vrot.slane %v2336_v59, 5  ;;  %v2400_v29 = vrot.slane %v2398_v17, 5 }
  0x9c   : > { %3463 = vmatpush3.bf16.msra.mxu1 %v3659_v9  ;;  %3440 = vmatprep.subr.bf16.mxu0 %v3662_v21 }
  0x9d   : > { %3464 = vmatprep.subr.bf16.mxu1 %v3663_v31  ;;  %v2325_v9 = vor.u32 %v2324_v63, %v2321_v62  ;;  %v2339_v14 = vor.u32 %v2338_v3, %v2335_v1  ;;  %v3139_v62 = vld [vmem:[%s4038_s9 + $0x24] sm:$0x1]  ;;  %v3145_v3 = vld [vmem:[%s4038_s9 + $0x3c] sm:$0x1] }
  0x9e   : > { %3409 = vmatmul.mubr.bf16.gmra.mxu0 %v3661_v28  ;;  %v2412_v11 = vshll.u32 %v3145_v3, 16 }
  0x9f   : > { %3441 = vmatpush3.bf16.msra.mxu0 %v3662_v21  ;;  %3433 = vmatmul.mubr.bf16.gmra.mxu1 %v3051_v38  ;;  %v2394_v21 = vrot.slane %v2392_v12, 5  ;;  %v2326_v23 = vrot.slane %v2325_v9, 4  ;;  %v2340_v24 = vrot.slane %v2339_v14, 4  ;;  %v3688_v9 = vld [vmem:[%s4504_s1 + $0x208] sm:$0xff]  }
  0xa0   : > { %3465 = vmatpush3.bf16.msra.mxu1 %v3663_v31  ;;  %3442 = vmatprep.subr.bf16.mxu0 %v3664_v37  ;;  %v2382_v31 = vrot.slane %v2381_v26, 4 }
  0xa1   : > { %3466 = vmatprep.subr.bf16.mxu1 %v3665_v39  ;;  %3452 = vmatprep.mubr.bf16.mxu0 %v3674_v40  ;;  %v2395_v28 = vor.u32 %v2394_v21, %v2391_v20  ;;  %v2331_v35 = vsel %vm4103_vm2, %v2326_v23, %v2330_v19  ;;  %v2345_v36 = vsel %vm4103_vm2, %v2340_v24, %v2344_v25  ;;  %v3685_v40 = vld [vmem:[%s4504_s1 + $0x220] sm:$0xff]   ;;  %v2414_v20 = vrot.slane %v2412_v11, 5 }
  0xa2   : > { %3476 = vmatprep.mubr.bf16.mxu1 %v3676_v42  ;;  %v2387_v38 = vsel %vm4103_vm2, %v2382_v31, %v2386_v27  ;;  %v3138_v42 = vld [vmem:[%s4038_s9 + $0x20] sm:$0xf] }
  0xa3   : > { %3443 = vmatpush3.bf16.msra.mxu0 %v3664_v37  ;;  %v2396_v32 = vrot.slane %v2395_v28, 4  ;;  %v3684_v37 = vld [vmem:[%s4038_s9 + $0x80] ss:$8 sps:$4 sm:$0xff]   ;;  %v2364_v50 = vshll.u32 %v3138_v42, 16 }
  0xa4   : > { %3467 = vmatpush3.bf16.msra.mxu1 %v3665_v39  ;;  %3444 = vmatprep.subr.bf16.mxu0 %v3666_v41 }
  0xa5   : > { %3468 = vmatprep.subr.bf16.mxu1 %v3667_v43  ;;  %v2401_v39 = vsel %vm4103_vm2, %v2396_v32, %v2400_v29  ;;  %v2366_v61 = vrot.slane %v2364_v50, 5 }
  0xa7   : > { %3445 = vmatpush3.bf16.msra.mxu0 %v3666_v41  ;;  %v3136_v41 = vld [vmem:[%s4038_s9 + $0x18] sm:$0xf] }
  0xa8   : > { %3469 = vmatpush3.bf16.msra.mxu1 %v3667_v43  ;;  %3446 = vmatprep.subr.bf16.mxu0 %v3668_v44  ;;  %v3164_v43 = vcombine.low %v2331_v35, %v2345_v36 }
  0xa9   : > { %3470 = vmatprep.subr.bf16.mxu1 %v3669_v45 }
  0xab   : > { %3447 = vmatpush3.bf16.msra.mxu0 %v3668_v44  ;;  %v3144_v44 = vld [vmem:[%s4038_s9 + $0x38] sm:$0xf] }
  0xac   : > { %3471 = vmatpush3.bf16.msra.mxu1 %v3669_v45  ;;  %3448 = vmatprep.subr.bf16.mxu0 %v3670_v46  ;;  %v3146_v45 = vld [vmem:[%s4038_s9 + $0x40] sm:$0xf]  ;;  %v2403_v52 = vshrl.u32 %v3144_v44, 16  ;;  %v2406_v53 = vshll.u32 %v3144_v44, 16 }
  0xad   : > { %3472 = vmatprep.subr.bf16.mxu1 %v3671_v47  ;;  %v2417_v54 = vshrl.u32 %v3146_v45, 16  ;;  %v2420_v55 = vshll.u32 %v3146_v45, 16 }
  0xae   : > { %v2405_v63 = vrot.slane %v2403_v52, 4  ;;  %v2408_v0 = vrot.slane %v2406_v53, 5 }
  0xaf   : > { %3449 = vmatpush3.bf16.msra.mxu0 %v3670_v46  ;;  %v3166_v46 = vcombine.low %v2387_v38, %v2401_v39  ;;  %v2419_v1 = vrot.slane %v2417_v54, 4  ;;  %v2422_v2 = vrot.slane %v2420_v55, 5 }
  0xb0   : > { %3473 = vmatpush3.bf16.msra.mxu1 %v3671_v47  ;;  %3450 = vmatprep.subr.bf16.mxu0 %v3672_v48  ;;  %v2347_v47 = vshrl.u32 %v3136_v41, 16  ;;  %v2409_v10 = vor.u32 %v2408_v0, %v2405_v63 }
  0xb1   : > { %3474 = vmatprep.subr.bf16.mxu1 %v3673_v49  ;;  %v2423_v12 = vor.u32 %v2422_v2, %v2419_v1 }
  0xb2   : > { %v2410_v19 = vrot.slane %v2409_v10, 4 }
  0xb3   : > { %3451 = vmatpush3.bf16.msra.mxu0 %v3672_v48  ;;  %v2350_v48 = vshll.u32 %v3136_v41, 16  ;;  %v2424_v21 = vrot.slane %v2423_v12, 4 }
  0xb4   : > { %3475 = vmatpush3.bf16.msra.mxu1 %v3673_v49  ;;  %3484 = vmatprep.subr.bf16.mxu0 %v3677_v58  ;;  %v2361_v49 = vshrl.u32 %v3138_v42, 16  ;;  %v2415_v25 = vsel %vm4103_vm2, %v2410_v19, %v2414_v20 }
  0xb5   : > { %3508 = vmatprep.subr.bf16.mxu1 %v3677_v58  ;;  %v2352_v59 = vrot.slane %v2350_v48, 5 }
  0xb6   : > { %3453 = vmatmul.mubr.bf16.vlgmr.msra.gmra.mxu0 %v3675_v57  ;;  %v3137_v57 = vld [vmem:[%s4038_s9 + $0x1c] sm:$0x1]  ;;  %v2363_v60 = vrot.slane %v2361_v49, 4  ;;  %s3696_s9 = scalar_lea.vmem %s3695_s5, 2048 }
  0xb7   : > { %3477 = vmatmul.mubr.bf16.vlgmr.msra.gmra.mxu1 %v3678_v8  ;;  %3485 = vmatpush3.bf16.msra.mxu0 %v3677_v58  ;;  %v2356_v6 = vshll.u32 %v3137_v57, 16  ;;  %v2370_v8 = vshll.u32 %v3139_v62, 16  ;;  %p3698_p4 = scmp.lt.s32.totalorder %s3696_s9, %s3690_s29 }
  0xb8   : > { %3516 = vmatpush3.bf16.msra.mxu1 %v3677_v58  ;;  %3486 = vmatprep.subr.bf16.mxu0 %v3679_v13  ;;  %v2349_v58 = vrot.slane %v2347_v47, 4  ;;  %v2367_v7 = vor.u32 %v2366_v61, %v2363_v60 }
  0xb9   : > { %3509 = vmatprep.subr.bf16.mxu1 %v3679_v13  ;;  %3456 = vmatprep.mubr.bf16.mxu0 %v3680_v18  ;;  %v2358_v15 = vrot.slane %v2356_v6, 5  ;;  %v2372_v17 = vrot.slane %v2370_v8, 5  ;;  %v3689_v18 = vld [vmem:[%s4504_s1 + $0x200] sm:$0xff]   ;;  %p3699_p6 = por %p3698_p4, %p3697_p3 }
  0xba   : > { %3480 = vmatprep.mubr.bf16.mxu1 %v3683_v22  ;;  %v2353_v5 = vor.u32 %v2352_v59, %v2349_v58  ;;  %v2368_v16 = vrot.slane %v2367_v7, 4 }
  0xbb   : > { %3487 = vmatpush3.bf16.msra.mxu0 %v3679_v13  ;;  %p3700_p7 = pnand %p3699_p6, %p3693_p2 }
  0xbc   : > { %3517 = vmatpush3.bf16.msra.mxu1 %v3679_v13  ;;  %3488 = vmatprep.subr.bf16.mxu0 %v3682_v30  ;;  %v2426_v13 = vshll.u32 %v3147_v4, 16  ;;  %v2354_v14 = vrot.slane %v2353_v5, 4  ;;  %v2373_v24 = vsel %vm4103_vm2, %v2368_v16, %v2372_v17 }
  0xbd   : > { %3510 = vmatprep.subr.bf16.mxu1 %v3682_v30 }
  0xbe   : > { %3457 = vmatmul.mubr.bf16.gmra.mxu0 %v3681_v34  ;;  %v2428_v22 = vrot.slane %v2426_v13, 5  ;;  %v2359_v23 = vsel %vm4103_vm2, %v2354_v14, %v2358_v15 }
  0xbf   : > { %3489 = vmatpush3.bf16.msra.mxu0 %v3682_v30  ;;  %3481 = vmatmul.mubr.bf16.gmra.mxu1 %v3684_v37  ;;  %v3165_v27 = vcombine.low %v2359_v23, %v2373_v24 }
  0xc0   : > { %3518 = vmatpush3.bf16.msra.mxu1 %v3682_v30  ;;  %3490 = vmatprep.subr.bf16.mxu0 %v3685_v40  ;;  %v2429_v26 = vsel %vm4103_vm2, %v2424_v21, %v2428_v22 }
  0xc1   : > { %3511 = vmatprep.subr.bf16.mxu1 %v3685_v40  ;;  %3500 = vmatprep.mubr.bf16.mxu0 %v3164_v43  ;;  %v3167_v28 = vcombine.low %v2415_v25, %v2429_v26 }
  0xc2   : > { %3504 = vmatprep.mubr.bf16.mxu1 %v3166_v46 }
  0xc3   : > { %3491 = vmatpush3.bf16.msra.mxu0 %v3685_v40 }
  0xc4   : > { %3519 = vmatpush3.bf16.msra.mxu1 %v3685_v40  ;;  %3492 = vmatprep.subr.bf16.mxu0 %v3686_v51 }
  0xc5   : > { %3512 = vmatprep.subr.bf16.mxu1 %v3686_v51 }
  0xc7   : > { %3493 = vmatpush3.bf16.msra.mxu0 %v3686_v51 }
  0xc8   : > { %3520 = vmatpush3.bf16.msra.mxu1 %v3686_v51  ;;  %3494 = vmatprep.subr.bf16.mxu0 %v3687_v56 }
  0xc9   : > { %3513 = vmatprep.subr.bf16.mxu1 %v3687_v56 }
  0xcb   : > { %3495 = vmatpush3.bf16.msra.mxu0 %v3687_v56 }
  0xcc   : > { %3521 = vmatpush3.bf16.msra.mxu1 %v3687_v56  ;;  %3496 = vmatprep.subr.bf16.mxu0 %v3688_v9 }
  0xcd   : > { %3514 = vmatprep.subr.bf16.mxu1 %v3688_v9 }
  0xcf   : > { %3497 = vmatpush3.bf16.msra.mxu0 %v3688_v9 }
  0xd0   : > { %3522 = vmatpush3.bf16.msra.mxu1 %v3688_v9  ;;  %3498 = vmatprep.subr.bf16.mxu0 %v3689_v18 }
  0xd1   : > { %3515 = vmatprep.subr.bf16.mxu1 %v3689_v18 }
  0xd3   : > { %3499 = vmatpush3.bf16.msra.mxu0 %v3689_v18 }
  0xd4   : > { %3523 = vmatpush3.bf16.msra.mxu1 %v3689_v18 }
  0xd6   : > { %3501 = vmatmul.mubr.bf16.vlgmr.msra.gmra.mxu0 %v3165_v27 }
  0xd7   : > { %3505 = vmatmul.mubr.bf16.vlgmr.msra.gmra.mxu1 %v3167_v28 }
 0x116   : > { %v3310_v29 = vpop.f32.mrf.mxu0 }
 0x117   : > { %v3334_v30 = vpop.f32.mrf.mxu1 }
 0x118   : > { %v710_v31 = vpop.f32.mrf.mxu0  ;;  %v932_v19 = vadd.f32 %v3334_v30, %v3310_v29 }
 0x119   : > { %v899_v32 = vpop.f32.mrf.mxu1 }
 0x11a   : > { %v3311_v34 = vpop.f32.mrf.mxu0  ;;  %v930_v22 = vadd.f32 %v899_v32, %v710_v31 }
 0x11b   : > { %v3335_v35 = vpop.f32.mrf.mxu1 }
 0x11c   : > { %v713_v36 = vpop.f32.mrf.mxu0  ;;  %v933_v27 = vadd.f32 %v3335_v35, %v3311_v34 }
 0x11d   : > { %v902_v37 = vpop.f32.mrf.mxu1 }
 0x11e   : > { %v3314_v38 = vpop.f32.mrf.mxu0 }
 0x11f   : > { %v3338_v39 = vpop.f32.mrf.mxu1 }
 0x120   : > { %v726_v40 = vpop.f32.mrf.mxu0  ;;  %v936_v20 = vadd.f32 %v3338_v39, %v3314_v38 }
 0x121   : > { %v915_v33 = vpop.f32.mrf.mxu1 }
 0x122   : > { %v3315_v41 = vpop.f32.mrf.mxu0  ;;  %v934_v25 = vadd.f32 %v915_v33, %v726_v40 }
 0x123   : > { %v3339_v42 = vpop.f32.mrf.mxu1 }
 0x124   : > { %v729_v43 = vpop.f32.mrf.mxu0 }
 0x125   : > { %v918_v44 = vpop.f32.mrf.mxu1 }
 0x126   : > { %v935_v30 = vadd.f32 %v918_v44, %v729_v43 }
 0x136   : > { %v3358_v45 = vpop.f32.mrf.mxu0 }
 0x137   : > { %v3382_v46 = vpop.f32.mrf.mxu1  ;;  %v1233_v23 = vadd.f32 %v3358_v45, %v932_v19 }
 0x138   : > { %v1200_v47 = vpop.f32.mrf.mxu0 }
 0x139   : > { %v1389_v48 = vpop.f32.mrf.mxu1  ;;  %v1231_v28 = vadd.f32 %v1200_v47, %v930_v22 }
 0x13a   : > { %v3359_v49 = vpop.f32.mrf.mxu0 }
 0x13b   : > { %v3383_v50 = vpop.f32.mrf.mxu1  ;;  %v1420_v31 = vadd.f32 %v1389_v48, %v1231_v28 }
 0x13c   : > { %v1203_v51 = vpop.f32.mrf.mxu0 }
 0x13d   : > { %v4349_v52 = vpop.f32.mrf.mxu1 }
 0x13e   : > { %4513 = vst [vmem:[#allocation11_spill] sm:$0xff] %v4349_v52  ;;  %v3362_v53 = vpop.f32.mrf.mxu0  ;;  %v931_v52 = vadd.f32 %v902_v37, %v713_v36 }
 0x13f   : > { %v3386_v54 = vpop.f32.mrf.mxu1  ;;  %v1237_v26 = vadd.f32 %v3362_v53, %v936_v20 }
 0x140   : > { %v1216_v55 = vpop.f32.mrf.mxu0  ;;  %v1232_v32 = vadd.f32 %v1203_v51, %v931_v52 }
 0x141   : > { %v1405_v56 = vpop.f32.mrf.mxu1  ;;  %v1426_v38 = vadd.f32 %v3386_v54, %v1237_v26 }
 0x142   : > { %v3363_v57 = vpop.f32.mrf.mxu0 }
 0x143   : > { %v3387_v58 = vpop.f32.mrf.mxu1 }
 0x144   : > { %v1219_v59 = vpop.f32.mrf.mxu0 }
 0x145   : > { %v1408_v60 = vpop.f32.mrf.mxu1  ;;  %v4520_v47 = vld [vmem:[#allocation11_spill] sm:$0xff] }
 0x146   : > { %v1421_v36 = vadd.f32 %v4520_v47, %v1232_v32 }
 0x156   : > { %v3406_v61 = vpop.f32.mrf.mxu0 }
 0x157   : > { %v3430_v62 = vpop.f32.mrf.mxu1 }
 0x158   : > { %v1578_v63 = vpop.f32.mrf.mxu0 }
 0x159   : > { %v1876_v0 = vpop.f32.mrf.mxu1  ;;  %v1609_v34 = vadd.f32 %v1578_v63, %v1420_v31 }
 0x15a   : > { %v3407_v1 = vpop.f32.mrf.mxu0 }
 0x15b   : > { %v4351_v2 = vpop.f32.mrf.mxu1  ;;  %v1907_v51 = vadd.f32 %v1876_v0, %v1609_v34 }
 0x15c   : > { %4514 = vst [vmem:[#allocation12_spill] sm:$0xff] %v4351_v2  ;;  %v1581_v3 = vpop.f32.mrf.mxu0 }
 0x15d   : > { %v4353_v4 = vpop.f32.mrf.mxu1  ;;  %v1610_v52 = vadd.f32 %v1581_v3, %v1421_v36 }
 0x15e   : > { %4515 = vst [vmem:[#allocation13_spill] sm:$0xff] %v4353_v4  ;;  %v3410_v5 = vpop.f32.mrf.mxu0  ;;  %v1235_v4 = vadd.f32 %v1216_v55, %v934_v25 }
 0x15f   : > { %v3434_v6 = vpop.f32.mrf.mxu1  ;;  %v1615_v33 = vadd.f32 %v3410_v5, %v1426_v38 }
 0x160   : > { %v1594_v7 = vpop.f32.mrf.mxu0  ;;  %v1424_v45 = vadd.f32 %v1405_v56, %v1235_v4 }
 0x161   : > { %v1892_v8 = vpop.f32.mrf.mxu1  ;;  %v1913_v44 = vadd.f32 %v3434_v6, %v1615_v33 }
 0x162   : > { %v3411_v9 = vpop.f32.mrf.mxu0 }
 0x163   : > { %v3435_v10 = vpop.f32.mrf.mxu1 }
 0x164   : > { %v1597_v11 = vpop.f32.mrf.mxu0 }
 0x165   : > { %v4355_v12 = vpop.f32.mrf.mxu1 }
 0x166   : > { %4516 = vst [vmem:[#allocation14_spill] sm:$0xff] %v4355_v12  ;;  %v937_v12 = vadd.f32 %v3339_v42, %v3315_v41  ;;  %v1613_v42 = vadd.f32 %v1594_v7, %v1424_v45 }
 0x168   : > { %v1238_v39 = vadd.f32 %v3363_v57, %v937_v12  ;;  %v1911_v56 = vadd.f32 %v1892_v8, %v1613_v42 }
 0x16a   : > { %v1427_v41 = vadd.f32 %v3387_v58, %v1238_v39 }
 0x176   : > { %v3454_v13 = vpop.f32.mrf.mxu0 }
 0x177   : > { %v3478_v14 = vpop.f32.mrf.mxu1 }
 0x178   : > { %v2066_v15 = vpop.f32.mrf.mxu0 }
 0x179   : > { %v4357_v16 = vpop.f32.mrf.mxu1  ;;  %v2097_v58 = vadd.f32 %v2066_v15, %v1907_v51 }
 0x17a   : > { %4517 = vst [vmem:[#allocation15_spill] sm:$0xff] %v4357_v16  ;;  %v3455_v17 = vpop.f32.mrf.mxu0  ;;  %v1422_v16 = vadd.f32 %v3382_v46, %v1233_v23 }
 0x17b   : > { %v4359_v18 = vpop.f32.mrf.mxu1 }
 0x17c   : > { %4518 = vst [vmem:[#allocation16_spill] sm:$0xff] %v4359_v18  ;;  %v2069_v21 = vpop.f32.mrf.mxu0  ;;  %v1234_v18 = vadd.f32 %v3359_v49, %v933_v27  ;;  %v1611_v19 = vadd.f32 %v3406_v61, %v1422_v16  ;;  %v1616_v49 = vadd.f32 %v3411_v9, %v1427_v41  ;;  %v4523_v9 = vld [vmem:[#allocation14_spill] sm:$0xff] }
 0x17d   : > { %v4361_v24 = vpop.f32.mrf.mxu1 }
 0x17e   : > { %4519 = vst [vmem:[#allocation17_spill] sm:$0xff] %v4361_v24  ;;  %v3458_v2 = vpop.f32.mrf.mxu0  ;;  %v1236_v24 = vadd.f32 %v1219_v59, %v935_v30  ;;  %v1423_v53 = vadd.f32 %v3383_v50, %v1234_v18  ;;  %v1909_v37 = vadd.f32 %v3430_v62, %v1611_v19  ;;  %v4521_v59 = vld [vmem:[#allocation12_spill] sm:$0xff]  ;;  %v1914_v63 = vadd.f32 %v3435_v10, %v1616_v49  ;;  %v4522_v62 = vld [vmem:[#allocation13_spill] sm:$0xff] }
 0x17f   : > { %v3482_v29 = vpop.f32.mrf.mxu1  ;;  %v2103_v50 = vadd.f32 %v3458_v2, %v1913_v44 }
 0x180   : > { %v2082_v40 = vpop.f32.mrf.mxu0  ;;  %v1612_v46 = vadd.f32 %v3407_v1, %v1423_v53  ;;  %v1425_v43 = vadd.f32 %v1408_v60, %v1236_v24  ;;  %v2099_v54 = vadd.f32 %v3454_v13, %v1909_v37  ;;  %v1908_v1 = vadd.f32 %v4522_v62, %v1610_v52 }
 0x181   : > { %v2271_v35 = vpop.f32.mrf.mxu1  ;;  %v2101_v4 = vadd.f32 %v2082_v40, %v1911_v56  ;;  %v2292_v3 = vadd.f32 %v3482_v29, %v2103_v50  ;;  %v4524_v8 = vld [vmem:[#allocation15_spill] sm:$0xff] }
 0x182   : > { %v3459_v48 = vpop.f32.mrf.mxu0  ;;  %v1614_v57 = vadd.f32 %v1597_v11, %v1425_v43  ;;  %v1910_v61 = vadd.f32 %v4521_v59, %v1612_v46  ;;  %v2288_v60 = vadd.f32 %v3478_v14, %v2099_v54  ;;  %v2286_v11 = vadd.f32 %v4524_v8, %v2097_v58 }
 0x183   : > { %v3483_v55 = vpop.f32.mrf.mxu1  ;;  %v2104_v12 = vadd.f32 %v3459_v48, %v1914_v63  ;;  %v2098_v2 = vadd.f32 %v2069_v21, %v1908_v1  ;;  %v2290_v18 = vadd.f32 %v2271_v35, %v2101_v4  ;;  %v4525_v23 = vld [vmem:[#allocation16_spill] sm:$0xff] }
 0x184   : > { %v2085_v5 = vpop.f32.mrf.mxu0  ;;  %v2100_v6 = vadd.f32 %v3455_v17, %v1910_v61  ;;  %v1912_v0 = vadd.f32 %v4523_v9, %v1614_v57 }
 0x185   : > { %v2274_v7 = vpop.f32.mrf.mxu1  ;;  %v2293_v25 = vadd.f32 %v3483_v55, %v2104_v12  ;;  %v4526_v21 = vld [vmem:[#allocation17_spill] sm:$0xff] }
 0x186   : > { %v2102_v10 = vadd.f32 %v2085_v5, %v1912_v0  ;;  %v2289_v14 = vadd.f32 %v4525_v23, %v2100_v6  ;;  %v2287_v28 = vadd.f32 %v4526_v21, %v2098_v2 }
 0x188   : > { %v2291_v38 = vadd.f32 %v2274_v7, %v2102_v10 }
 0x196   : > { %v3502_v13 = vpop.f32.mrf.mxu0 }
 0x197   : > { %v2586_v16 = vadd.f32 %v3502_v13, %v2288_v60  ;;  %v3506_v15 = vpop.f32.mrf.mxu1 }
 0x198   : > { %v4369_v20 = vadd.f32 %v3506_v15, %v2292_v3  ;;  %v2553_v22 = vpop.f32.mrf.mxu0 }
 0x199   : > { %2610 = vst [vmem:[%s545_s10 + $0x10] sm:$0xff] %v2586_v16  ;;  %v2584_v17 = vadd.f32 %v2553_v22, %v2286_v11  ;;  %v2569_v24 = vpop.f32.mrf.mxu1  ;;  %v2632_v34 = vmul.f32 %v2586_v16, %v2586_v16 }
 0x19a   : > { %2614 = vst [vmem:[%s545_s10 + $0x30] sm:$0xff] %v4369_v20  ;;  %v2588_v26 = vadd.f32 %v2569_v24, %v2290_v18  ;;  %v3503_v27 = vpop.f32.mrf.mxu0 }
 0x19b   : > { %2608 = vst [vmem:[%s545_s10] sm:$0xff] %v2584_v17  ;;  %v2587_v29 = vadd.f32 %v3503_v27, %v2289_v14  ;;  %v3507_v30 = vpop.f32.mrf.mxu1  ;;  %v2630_v33 = vmul.f32 %v2584_v17, %v2584_v17 }
 0x19c   : > { %2612 = vst [vmem:[%s545_s10 + $0x20] sm:$0xff] %v2588_v26  ;;  %v2591_v39 = vadd.f32 %v3507_v30, %v2293_v25  ;;  %v2556_v31 = vpop.f32.mrf.mxu0 }
 0x19d   : > { %2611 = vst [vmem:[%s545_s10 + $0x18] sm:$0xff] %v2587_v29  ;;  %v2585_v32 = vadd.f32 %v2556_v31, %v2287_v28  ;;  %v2572_v19 = vpop.f32.mrf.mxu1 }
 0x19e   : > { %2615 = vst [vmem:[%s545_s10 + $0x38] sm:$0xff] %v2591_v39  ;;  %v2589_v45 = vadd.f32 %v2572_v19, %v2291_v38 }
 0x19f   : > { %2609 = vst [vmem:[%s545_s10 + $0x8] sm:$0xff] %v2585_v32  ;;  %v2616_v40 = vadd.f32 %v2585_v32, %v2584_v17  ;;  %v2631_v53 = vmul.f32 %v2585_v32, %v2585_v32 }
 0x1a0   : > { %2613 = vst [vmem:[%s545_s10 + $0x28] sm:$0xff] %v2589_v45 }
 0x1a1   : > { %v2617_v35 = vadd.f32 %v2616_v40, %v2586_v16  ;;  %v2638_v41 = vadd.f32 %v2631_v53, %v2630_v33 }
 0x1a2   : > { %3703 = shalt.err (!%p3700_p7)
}
 0x1a3   : > { %s3704_s6 = scalar_lea.hbm %s4378_s24, 1024  ;;  %s3708_s11 = scalar_lea.hbm %s4505_s2, 2048 }
 0x1a4   : > { %p3705_p8 = scmp.ne.s32.totalorder %s4378_s24, %s3704_s6  ;;  %p3709_p13 = scmp.lt.s32.totalorder %s4378_s24, %s4505_s2 }
 0x1a5   : > { %p3710_p0 = scmp.lt.s32.totalorder %s3708_s11, %s3704_s6 }
 0x1a6   : > { %p3706_p11 = pnand %p3705_p8, %p3895_p5 }
 0x1a7   : > { %p3711_p1 = por %p3710_p0, %p3709_p13 }
 0x1a8   : > { %p3707_p12 = pneg %p3706_p11 }
 0x1aa   : > { %p3712_p2 = pnand %p3711_p1, %p3707_p12 }
 0x1ac   : > { %3715 = shalt.err (!%p3712_p2)
}
 0x1ad   : > { %s3825_s29 = smov 128   ;;  %s3826_s30 = smov 8   ;;  %v2633_v42 = vmul.f32 %v2587_v29, %v2587_v29  ;;  %v2639_v47 = vadd.f32 %v2638_v41, %v2632_v34  ;;  %v2618_v36 = vadd.f32 %v2617_v35, %v2587_v29  ;;  %v2634_v37 = vmul.f32 %v2588_v26, %v2588_v26 }
 0x1ae   : > { %3527 = dma.vmem_to_hbm [thread:$0]  (%p3895_p5), %s4380_s12, 1024, %s4378_s24, %s2653_s26, %s3825_s29, %s3825_s29, %s3826_s30   ;;  %v2635_v49 = vmul.f32 %v2589_v45, %v2589_v45  ;;  %v2636_v51 = vmul.f32 %v4369_v20, %v4369_v20  ;;  %v2637_v55 = vmul.f32 %v2591_v39, %v2591_v39 }
 0x1af   : > { %v2619_v46 = vadd.f32 %v2618_v36, %v2588_v26  ;;  %v2640_v43 = vadd.f32 %v2639_v47, %v2633_v42  ;;  %s4410_s12 = sand.u32 1, %s2861_s21   ;;  %s3179_s24 = sshll.u32 %s3814_s18, 4 }
 0x1b0   : > { %s551_s26 = scalar_lea.vmem [#allocation6], %s4017_s8  ;;  %s557_s9 = scalar_lea.vmem [#allocation8], %s4017_s8 }
 0x1b1   : > { %v2620_v44 = vadd.f32 %v2619_v46, %v2589_v45  ;;  %v2641_v48 = vadd.f32 %v2640_v43, %v2634_v37  ;;  %s2693_s5 = sshll.u32 %s551_s26, 4  ;;  %s2707_s6 = sshll.u32 %s557_s9, 4  ;;  %s4422_s5 = int_to_ptr.vmem [resolvable:$true] %s2693_s5  ;;  %s4429_s6 = int_to_ptr.vmem [resolvable:$true] %s2707_s6 }
 0x1b2   : > { %s4420_s11 = scalar_lea.hbm %s4506_s3, %s3179_s24  ;;  %s4427_s13 = scalar_lea.hbm %s4507_s4, %s3179_s24 }
 0x1b3   : > { %v2621_v52 = vadd.f32 %v2620_v44, %v4369_v20  ;;  %v2642_v54 = vadd.f32 %v2641_v48, %v2635_v49  ;;  %s2658_s14 = scalar_lea.sflag [#allocation7], %s4410_s12  ;;  %s3716_s29 = scalar_lea.vmem %s4422_s5, 16 }
 0x1b4   : > { %p3717_p3 = scmp.ne.s32.totalorder %s4422_s5, %s3716_s29  ;;  %s3827_s30 = smov [#allocation6]  }
 0x1b5   : > { %v2622_v56 = vadd.f32 %v2621_v52, %v2591_v39  ;;  %v2643_v57 = vadd.f32 %v2642_v54, %v2636_v51  ;;  %s3720_s7 = sshll.u32 %s3827_s30, 4  ;;  %s3721_s7 = int_to_ptr.vmem [resolvable:$false] %s3720_s7 }
 0x1b6   : > { %p3718_p4 = pnand %p3717_p3, %p3895_p5  ;;  %s3722_s10 = scalar_lea.vmem %s3721_s7, 32 }
 0x1b7   : > { %v2623_v50 = vrot.slane %v2622_v56, 4  ;;  %v2644_v59 = vadd.f32 %v2643_v57, %v2637_v55  ;;  %p3723_p7 = scmp.lt.s32.totalorder %s4422_s5, %s3721_s7  ;;  %p3724_p8 = scmp.lt.s32.totalorder %s3722_s10, %s3716_s29 }
 0x1b8   : > { %p3719_p6 = pneg %p3718_p4 }
 0x1b9   : > { %v2645_v61 = vrot.slane %v2644_v59, 4  ;;  %v2624_v58 = vadd.f32 %v2623_v50, %v2622_v56  ;;  %p3725_p11 = por %p3724_p8, %p3723_p7 }
 0x1bb   : > { %v2625_v63 = vrot.slane %v2624_v58, 2  ;;  %v2646_v4 = vadd.f32 %v2645_v61, %v2644_v59  ;;  %p3726_p12 = pnand %p3725_p11, %p3719_p6 }
 0x1bd   : > { %v2626_v5 = vadd.f32 %v2625_v63, %v2624_v58  ;;  %v2647_v62 = vrot.slane %v2646_v4, 2 }
 0x1bf   : > { %v2627_v1 = vrot.slane %v2626_v5, 1  ;;  %v2648_v60 = vadd.f32 %v2647_v62, %v2646_v4 }
 0x1c1   : > { %v2628_v6 = vadd.f32 %v2627_v1, %v2626_v5  ;;  %v2649_v7 = vrot.slane %v2648_v60, 1 }
 0x1c3   : > { %2629 = vst [vmem:[%s551_s26] sm:$0x1] %v2628_v6  ;;  %v2650_v9 = vadd.f32 %v2649_v7, %v2648_v60 }
 0x1c4   : > { %3729 = shalt.err (!%p3726_p12)
}
 0x1c5   : > { %s3730_s24 = scalar_lea.hbm %s4420_s11, 16  ;;  %s3734_s21 = scalar_lea.hbm %s4506_s3, 32 }
 0x1c6   : > { %p3731_p13 = scmp.ne.s32.totalorder %s4420_s11, %s3730_s24  ;;  %p3735_p2 = scmp.lt.s32.totalorder %s4420_s11, %s4506_s3 }
 0x1c7   : > { %p3736_p3 = scmp.lt.s32.totalorder %s3734_s21, %s3730_s24 }
 0x1c8   : > { %p3732_p0 = pnand %p3731_p13, %p3895_p5 }
 0x1c9   : > { %p3737_p4 = por %p3736_p3, %p3735_p2 }
 0x1ca   : > { %p3733_p1 = pneg %p3732_p0 }
 0x1cc   : > { %p3738_p6 = pnand %p3737_p4, %p3733_p1 }
 0x1ce   : > { %3741 = shalt.err (!%p3738_p6)
}
 0x1cf   : > { %3528 = dma.vmem_to_hbm [thread:$0]  (%p3895_p5), %s4422_s5, 16, %s4420_s11, %s2658_s14   ;;  %2651 = vst [vmem:[%s557_s9] sm:$0x1] %v2650_v9 }
 0x1d0   : > { %s3742_s22 = scalar_lea.vmem %s4429_s6, 16  ;;  %s3828_s29 = smov [#allocation8]  }
 0x1d1   : > { %p3743_p7 = scmp.ne.s32.totalorder %s4429_s6, %s3742_s22  ;;  %s3746_s7 = sshll.u32 %s3828_s29, 4  ;;  %s3747_s7 = int_to_ptr.vmem [resolvable:$false] %s3746_s7 }
 0x1d2   : > { %s3748_s10 = scalar_lea.vmem %s3747_s7, 32  ;;  %p3749_p12 = scmp.lt.s32.totalorder %s4429_s6, %s3747_s7 }
 0x1d3   : > { %p3744_p8 = pnand %p3743_p7, %p3895_p5  ;;  %p3750_p13 = scmp.lt.s32.totalorder %s3748_s10, %s3742_s22 }
 0x1d5   : > { %p3745_p11 = pneg %p3744_p8  ;;  %p3751_p0 = por %p3750_p13, %p3749_p12 }
 0x1d7   : > { %p3752_p1 = pnand %p3751_p0, %p3745_p11 }
 0x1d9   : > { %3755 = shalt.err (!%p3752_p1)
}
 0x1da   : > { %s3756_s8 = scalar_lea.hbm %s4427_s13, 16  ;;  %s3760_s11 = scalar_lea.hbm %s4507_s4, 32 }
 0x1db   : > { %p3757_p2 = scmp.ne.s32.totalorder %s4427_s13, %s3756_s8  ;;  %p3761_p6 = scmp.lt.s32.totalorder %s4427_s13, %s4507_s4 }
 0x1dc   : > { %p3762_p7 = scmp.lt.s32.totalorder %s3760_s11, %s3756_s8 }
 0x1dd   : > { %p3758_p3 = pnand %p3757_p2, %p3895_p5 }
 0x1de   : > { %p3763_p8 = por %p3762_p7, %p3761_p6 }
 0x1df   : > { %p3759_p4 = pneg %p3758_p3 }
 0x1e1   : > { %p3764_p11 = pnand %p3763_p8, %p3759_p4 }
 0x1e3   : > { %3767 = shalt.err (!%p3764_p11)
}
 0x1e4   : > { %3529 = dma.vmem_to_hbm [thread:$0]  (%p3895_p5), %s4429_s6, 16, %s4427_s13, %s2658_s14  }
 0x1e5 PF: > { %s2719_s18 = sand.u32 1, %s3802_s15   ;;  %p3534_p12 = pnand %p2864_p10, %p3908_p9 }
 0x1e6   : > { %s2720_s21 = scalar_lea.sflag [#allocation5], %s2719_s18 }
 0x1e7   : > { %p3535_p13 = pneg %p3534_p12 }
 0x1e9   : > { %3793 = dma.done.wait (%p3535_p13), %s2720_s21, 1024  }
 0x1ea   : > { %3795 = vsyncadd (%p3535_p13), %s2720_s21, 4294966272  ;;  %s4527_s30 = sadd.s32 4294967294, %s3822_s20  }
 0x1eb   : > { %s2728_s25 = sand.u32 1, %s4527_s30  }
 0x1ec   : > { %s2729_s22 = scalar_lea.sflag [#allocation7], %s2728_s25 }
 0x1ed   : > { %3797 = dma.done.wait (%p3535_p13), %s2729_s22, 32  }
 0x1ee   : > { %3799 = vsyncadd (%p3535_p13), %s2729_s22, 4294967264  ;;  %s21_s20 = sadd.s32 1, %s3822_s20   ;;  %s4528_s15 = smov %s3806_s16 }
 0x1ef   : > { %p18_p5 = scmp.ge.s32.totalorder %s21_s20, 4   ;;  %s4529_s16 = smov %s3810_s17 }
 0x1f0   : > { %s4530_s17 = smov %s3906_s27  ;;  %s4531_s18 = smov %s3818_s19 }
 0x1f1   : > { %s4532_s19 = smov %s4534_s23  ;;  %20 = sbr.rel (!%p18_p5) target bundleno = 6 (0x6), region = 155 }
 0x1f6   :  { %2741 = vsyncpa [#allocation5], 1 }
 0x1f7   :  { %2743 = vsyncpa [#allocation5 + $0x1], 1 }
 0x1f8   :  { %2744 = vsyncpa [#allocation7], 1 }
 0x1f9   :  { %2746 = vsyncpa [#allocation7 + $0x1], 1 }

</bundles_post_ra>
